<compile_context>
chip_gen: v7x
topology: tpu7x:2x2x1
jax: 0.10.0
libtpu: 0.0.40
codegen_flags: <defaults>
</compile_context>

<pallas_src>
import functools
import math

import jax
import jax.numpy as jnp
from jax.experimental import pallas as pl
from jax.experimental.pallas import tpu as pltpu


# ----------------------------------------------------------------------------
# Pallas kernel: all encoder layers for one batch block
# ----------------------------------------------------------------------------
def _layer_norm(x, gamma, beta, eps=1e-5):
    mean = jnp.mean(x, axis=-1, keepdims=True)
    var = jnp.mean((x - mean) ** 2, axis=-1, keepdims=True)
    return (x - mean) * jax.lax.rsqrt(var + eps) * gamma + beta


def encoder_layers_kernel(
    x_ref,                      # (TB, L, E) bf16 embeddings (+PE), read at l==0
    wqkv_ref,                   # (E, 3E) bf16 fused block-diag Q/K/V (scale baked into Q)
    wo_ref, bo_ref,             # (E, E) bf16, (1, E) f32 output projection
    g1_ref, be1_ref,            # (1, E) f32 LayerNorm 1 scale/shift
    w1_ref, bf1_ref,            # (E, F) bf16, (1, F) f32 FFN first linear
    w2_ref, bf2_ref,            # (F, E) bf16, (1, E) f32 FFN second linear
    g2_ref, be2_ref,            # (1, E) f32 LayerNorm 2 scale/shift
    o_ref,                      # (TB, L, E) bf16 output (written at l==last)
    act_ref,                    # (TB*L, E) f32 VMEM scratch: layer-carried activation
    *, heads, head_dim,
):
    TB, L, E = x_ref.shape
    H, D = heads, head_dim
    l_idx = pl.program_id(1)

    # Load the embeddings into the carry scratch on the first layer only.
    @pl.when(l_idx == 0)
    def _():
        act_ref[...] = x_ref[...].reshape(TB * L, E).astype(jnp.float32)

    x_f32 = act_ref[...]                              # (TB*L, E) f32 residual carry
    x_bf = x_f32.astype(jnp.bfloat16)                 # bf16 MXU operand

    # --- fused, lane-dense Q/K/V projection: one (TB*L, E) @ (E, 3E) MXU op ---
    # softmax scale 1/sqrt(E) is pre-baked into the Q columns (host side).
    qkv = jnp.dot(x_bf, wqkv_ref[...], preferred_element_type=jnp.float32)
    q = qkv[:, 0:E].reshape(TB, L, E).astype(jnp.bfloat16)
    k = qkv[:, E:2 * E].reshape(TB, L, E).astype(jnp.bfloat16)
    v = qkv[:, 2 * E:3 * E].reshape(TB, L, E).astype(jnp.bfloat16)

    # --- per-head attention; output projection accumulated per head ----------
    # (sum_h ctx_h @ wo[hD:(h+1)D, :]  ==  concat_h(ctx_h) @ wo, without the
    #  f32 context scratch or 32-lane masked stores)
    attn_acc = jnp.zeros((TB * L, E), jnp.float32)
    for h in range(H):                                # static unroll, H is small
        sl = slice(h * D, (h + 1) * D)
        qh, kh, vh = q[..., sl], k[..., sl], v[..., sl]          # (TB, L, D) bf16
        energy = jnp.einsum("bqd,bkd->bqk", qh, kh,
                            preferred_element_type=jnp.float32)
        energy = energy - jnp.max(energy, axis=-1, keepdims=True)
        p = jnp.exp(energy)
        attn = p * pl.reciprocal(jnp.sum(p, axis=-1, keepdims=True), approx=True)
        ctx_h = jnp.einsum("bqk,bkd->bqd", attn.astype(jnp.bfloat16), vh,
                           preferred_element_type=jnp.float32)   # (TB, L, D) f32
        attn_acc += jnp.dot(ctx_h.reshape(TB * L, D).astype(jnp.bfloat16),
                            wo_ref[sl, :],
                            preferred_element_type=jnp.float32)

    # --- output bias + residual + LayerNorm 1 ---------------------------------
    x1 = _layer_norm(attn_acc + bo_ref[...] + x_f32, g1_ref[...], be1_ref[...])

    # --- feed-forward (E -> F -> E, ReLU) + residual + LayerNorm 2 -------------
    hidden = jnp.maximum(
        jnp.dot(x1.astype(jnp.bfloat16), w1_ref[...],
                preferred_element_type=jnp.float32) + bf1_ref[...],
        0.0,
    )
    ff = jnp.dot(hidden.astype(jnp.bfloat16), w2_ref[...],
                 preferred_element_type=jnp.float32) + bf2_ref[...]
    x2 = _layer_norm(ff + x1, g2_ref[...], be2_ref[...])

    # Carry to the next layer; store to HBM only after the last layer.
    act_ref[...] = x2

    @pl.when(l_idx == pl.num_programs(1) - 1)
    def _():
        o_ref[...] = x2.reshape(TB, L, E).astype(o_ref.dtype)


# ----------------------------------------------------------------------------
# Wrapper
# ----------------------------------------------------------------------------
_PARAM_ORDER = ("wqkv", "wo", "bo", "g1", "be1",
                "w1", "bf1", "w2", "bf2", "g2", "be2")

_VMEM_LIMIT_BYTES = 48 << 20          # explicit scoped-VMEM limit (headroom on v7x)


def _pick_block_b(B, L, E, F, vmem_budget_bytes=40 << 20):
    """TB from a VMEM budget; keep >=2 blocks on the parallel batch axis."""
    # rough per-(batch*seq)-row footprint of in-kernel intermediates
    per_row_bytes = 4 * (7 * E + F) + 2 * 3 * E + 4 * 2 * L
    tb_budget = max(1, (vmem_budget_bytes // per_row_bytes) // max(L, 1))
    tb = min(B, tb_budget)
    # v7x has 2 TensorCores: prefer a length->=2 "parallel" grid axis when B allows
    if tb == B and B > 1 and B % 2 == 0:
        tb = B // 2
    while B % tb:                     # snap down to a divisor of B
        tb -= 1
    return tb


def encoder_layers(x, stacked, heads):
    """Run all encoder layers in ONE pallas_call (layer axis fused into the grid)."""
    B, L, E = x.shape
    D = E // heads
    num_layers = stacked["wqkv"].shape[0]
    F = stacked["w1"].shape[-1]
    TB = _pick_block_b(B, L, E, F)

    kernel = functools.partial(encoder_layers_kernel, heads=heads, head_dim=D)

    def wspec(shape):                 # layer-stacked param: leading layer dim squeezed
        return pl.BlockSpec((None,) + tuple(shape[1:]), lambda b, l: (l, 0, 0))

    in_specs = [pl.BlockSpec((TB, L, E), lambda b, l: (b, 0, 0))]
    in_specs += [wspec(stacked[name].shape) for name in _PARAM_ORDER]

    return pl.pallas_call(
        kernel,
        out_shape=jax.ShapeDtypeStruct((B, L, E), x.dtype),
        grid=(B // TB, num_layers),
        in_specs=in_specs,
        out_specs=pl.BlockSpec((TB, L, E), lambda b, l: (b, 0, 0)),
        scratch_shapes=[pltpu.VMEM((TB * L, E), jnp.float32)],
        compiler_params=pltpu.CompilerParams(
            dimension_semantics=("parallel", "arbitrary"),
            vmem_limit_bytes=_VMEM_LIMIT_BYTES,
        ),
    )(x, *[stacked[name] for name in _PARAM_ORDER])


def encoder_forward(token_ids, embed_table, pe, stacked_params, heads):
    B, L = token_ids.shape
    # Embedding gather with the positional-encoding add fused into the same XLA
    # fusion (no standalone elementwise pallas_call).  Dropout = identity (eval).
    x = (embed_table[token_ids] + pe[None, :L, :]).astype(jnp.bfloat16)
    return encoder_layers(x, stacked_params, heads)


# ----------------------------------------------------------------------------
# Host-side parameter preparation (layout plumbing, done once)
# ----------------------------------------------------------------------------
def prepare_block_params(raw, heads, mm_dtype=jnp.bfloat16):
    """PyTorch-convention params -> kernel layout.

    The reference shares one (D, D) projection across all heads, i.e. a
    block-diagonal (E, E) matrix on the full embedding, so Q/K/V fuse into a
    single lane-dense (E, 3E) weight; the 1/sqrt(E) softmax scale is baked into
    the Q columns.  Large weights are pre-transposed (y = x @ W) and cast to
    bf16; per-channel params stay f32.
    # TODO(synk): at large H/E the block-diagonal QKV wastes H x FLOPs/bytes;
    #             switch to a per-head batched dot_general for production sizes.
    """
    H = heads
    E = raw["wo"].shape[0]
    eye = jnp.eye(H, dtype=jnp.float32)

    def block_diag_t(w):                       # (D, D) -> (E, E) of w.T blocks
        return jnp.kron(eye, w.T.astype(jnp.float32))

    scale = 1.0 / math.sqrt(float(E))          # reference: energy / sqrt(embed_size)
    wqkv = jnp.concatenate(
        [block_diag_t(raw["wq"]) * scale,
         block_diag_t(raw["wk"]),
         block_diag_t(raw["wv"])],
        axis=1,
    )
    return {
        "wqkv": wqkv.astype(mm_dtype),                    # (E, 3E)
        "wo": raw["wo"].T.astype(mm_dtype),               # (E, E)
        "bo": raw["bo"].astype(jnp.float32),              # (1, E)
        "g1": raw["g1"].astype(jnp.float32),
        "be1": raw["be1"].astype(jnp.float32),
        "w1": raw["w1"].T.astype(mm_dtype),               # (E, F)
        "bf1": raw["bf1"].astype(jnp.float32),            # (1, F)
        "w2": raw["w2"].T.astype(mm_dtype),               # (F, E)
        "bf2": raw["bf2"].astype(jnp.float32),            # (1, E)
        "g2": raw["g2"].astype(jnp.float32),
        "be2": raw["be2"].astype(jnp.float32),
    }


def stack_layer_params(prepared_list):
    """Stack per-layer prepared params along a leading num_layers axis."""
    return {name: jnp.stack([p[name] for p in prepared_list], axis=0)
            for name in _PARAM_ORDER}


# ----------------------------------------------------------------------------
# Deterministic parameter construction (PyTorch conventions)
# ----------------------------------------------------------------------------
def sinusoidal_pe(max_len, d_model):
    pos = jnp.arange(max_len, dtype=jnp.float32)[:, None]
    div = jnp.exp(
        jnp.arange(0, d_model, 2, dtype=jnp.float32)
        * (-math.log(10000.0) / d_model)
    )
    pe = jnp.zeros((max_len, d_model), dtype=jnp.float32)
    pe = pe.at[:, 0::2].set(jnp.sin(pos * div))
    pe = pe.at[:, 1::2].set(jnp.cos(pos * div))
    return pe


def make_layer_params(key, embed_size, heads, forward_expansion):
    D = embed_size // heads
    F = forward_expansion * embed_size
    ks = jax.random.split(key, 6)
    s = 0.02
    return {
        "wq": s * jax.random.normal(ks[0], (D, D), jnp.float32),
        "wk": s * jax.random.normal(ks[1], (D, D), jnp.float32),
        "wv": s * jax.random.normal(ks[2], (D, D), jnp.float32),
        "wo": s * jax.random.normal(ks[3], (embed_size, embed_size), jnp.float32),
        "bo": jnp.zeros((1, embed_size), jnp.float32),
        "g1": jnp.ones((1, embed_size), jnp.float32),
        "be1": jnp.zeros((1, embed_size), jnp.float32),
        "w1": s * jax.random.normal(ks[4], (F, embed_size), jnp.float32),
        "bf1": jnp.zeros((1, F), jnp.float32),
        "w2": s * jax.random.normal(ks[5], (embed_size, F), jnp.float32),
        "bf2": jnp.zeros((1, embed_size), jnp.float32),
        "g2": jnp.ones((1, embed_size), jnp.float32),
        "be2": jnp.zeros((1, embed_size), jnp.float32),
    }


# ----------------------------------------------------------------------------
if __name__ == "__main__":
    src_vocab_size = 50
    embed_size = 128          # multiple of 128 -> lane-dense stores
    num_layers = 2
    heads = 4                 # head_dim = 32
    forward_expansion = 4     # F = 512
    max_len = 32
    B, L = 4, 16              # small demo shapes; TB=2 -> 2 parallel batch blocks

    root = jax.random.PRNGKey(0)
    k_tok, k_emb, k_layers = jax.random.split(root, 3)

    token_ids = jax.random.randint(k_tok, (B, L), 0, src_vocab_size)
    embed_table = 0.02 * jax.random.normal(
        k_emb, (src_vocab_size, embed_size), jnp.float32
    )
    pe = sinusoidal_pe(max_len, embed_size)

    layer_keys = jax.random.split(k_layers, num_layers)
    raw_layer_params = [
        make_layer_params(k, embed_size, heads, forward_expansion)
        for k in layer_keys
    ]
    stacked = stack_layer_params(
        [prepare_block_params(p, heads) for p in raw_layer_params]
    )

    out = encoder_forward(token_ids, embed_table, pe, stacked, heads)
    out = jax.block_until_ready(out)
    assert out.shape == (B, L, embed_size)
    assert bool(jnp.all(jnp.isfinite(out.astype(jnp.float32))))
    print("KERNEL_OK")
</pallas_src>

<mosaic_0001>
module attributes {stable_mosaic.version = 11 : i64} {
  func.func @encoder_layers_kernel(%arg0: i32, %arg1: i32, %arg2: memref<2x16x128xbf16, #tpu.memory_space<vmem>>, %arg3: memref<1x128x384xbf16, #tpu.memory_space<vmem>>, %arg4: memref<1x128x128xbf16, #tpu.memory_space<vmem>>, %arg5: memref<1x1x128xf32, #tpu.memory_space<vmem>>, %arg6: memref<1x1x128xf32, #tpu.memory_space<vmem>>, %arg7: memref<1x1x128xf32, #tpu.memory_space<vmem>>, %arg8: memref<1x128x512xbf16, #tpu.memory_space<vmem>>, %arg9: memref<1x1x512xf32, #tpu.memory_space<vmem>>, %arg10: memref<1x512x128xbf16, #tpu.memory_space<vmem>>, %arg11: memref<1x1x128xf32, #tpu.memory_space<vmem>>, %arg12: memref<1x1x128xf32, #tpu.memory_space<vmem>>, %arg13: memref<1x1x128xf32, #tpu.memory_space<vmem>>, %arg14: memref<2x16x128xbf16, #tpu.memory_space<vmem>>, %arg15: memref<32x128xf32, #tpu.memory_space<vmem>>) attributes {dimension_semantics = [#tpu.dimension_semantics<parallel>, #tpu.dimension_semantics<arbitrary>], iteration_bounds = array<i64: 2, 2>, scalar_prefetch = 0 : i64, scratch_operands = 1 : i64, tpu.core_type = #tpu.core_type<tc>, window_params = [{transform_indices = @transform_0, window_bounds = array<i64: 2, 16, 128>}, {transform_indices = @transform_1, window_bounds = array<i64: 1, 128, 384>}, {transform_indices = @transform_2, window_bounds = array<i64: 1, 128, 128>}, {transform_indices = @transform_3, window_bounds = array<i64: 1, 1, 128>}, {transform_indices = @transform_4, window_bounds = array<i64: 1, 1, 128>}, {transform_indices = @transform_5, window_bounds = array<i64: 1, 1, 128>}, {transform_indices = @transform_6, window_bounds = array<i64: 1, 128, 512>}, {transform_indices = @transform_7, window_bounds = array<i64: 1, 1, 512>}, {transform_indices = @transform_8, window_bounds = array<i64: 1, 512, 128>}, {transform_indices = @transform_9, window_bounds = array<i64: 1, 1, 128>}, {transform_indices = @transform_10, window_bounds = array<i64: 1, 1, 128>}, {transform_indices = @transform_11, window_bounds = array<i64: 1, 1, 128>}, {transform_indices = @transform_12, window_bounds = array<i64: 2, 16, 128>}]} {
    %c0_i32 = arith.constant 0 : i32
    %0 = arith.cmpi eq, %arg1, %c0_i32 : i32
    %1 = arith.extui %0 : i1 to i32
    %c0_i32_0 = arith.constant 0 : i32
    %2 = arith.cmpi ne, %1, %c0_i32_0 : i32
    scf.if %2 {
      %c0_78 = arith.constant 0 : index
      %c0_79 = arith.constant 0 : index
      %c0_80 = arith.constant 0 : index
      %186 = vector.load %arg2[%c0_78, %c0_79, %c0_80] : memref<2x16x128xbf16, #tpu.memory_space<vmem>>, vector<2x16x128xbf16>
      %187 = vector.shape_cast %186 : vector<2x16x128xbf16> to vector<32x128xbf16>
      %188 = arith.extf %187 : vector<32x128xbf16> to vector<32x128xf32>
      %c0_81 = arith.constant 0 : index
      %c0_82 = arith.constant 0 : index
      %189 = vector.load %arg15[%c0_81, %c0_82] : memref<32x128xf32, #tpu.memory_space<vmem>>, vector<32x128xf32>
      tpu.vector_store %arg15[%c0_81, %c0_82], %188 {strides = array<i32>} : memref<32x128xf32, #tpu.memory_space<vmem>>, vector<32x128xf32>,
    } else {
    }
    %c0 = arith.constant 0 : index
    %c0_1 = arith.constant 0 : index
    %3 = vector.load %arg15[%c0, %c0_1] : memref<32x128xf32, #tpu.memory_space<vmem>>, vector<32x128xf32>
    %4 = arith.truncf %3 : vector<32x128xf32> to vector<32x128xbf16>
    %c0_2 = arith.constant 0 : index
    %c0_3 = arith.constant 0 : index
    %c0_4 = arith.constant 0 : index
    %5 = vector.load %arg3[%c0_2, %c0_3, %c0_4] : memref<1x128x384xbf16, #tpu.memory_space<vmem>>, vector<1x128x384xbf16>
    %6 = vector.shape_cast %5 : vector<1x128x384xbf16> to vector<128x384xbf16>
    %cst = arith.constant dense<0.000000e+00> : vector<32x384xf32>
    %7 = tpu.matmul %4, %6, %cst {dimension_numbers = #tpu.dot_dimension_numbers<[1], [0], [0], [1], [0, 0, 1, 1], [], []>} : vector<32x128xbf16>, vector<128x384xbf16>, vector<32x384xf32> -> vector<32x384xf32>
    %8 = vector.extract_strided_slice %7 {offsets = [0, 0], sizes = [32, 128], strides = [1, 1]} : vector<32x384xf32> to vector<32x128xf32>
    %9 = vector.shape_cast %8 : vector<32x128xf32> to vector<2x16x128xf32>
    %10 = arith.truncf %9 : vector<2x16x128xf32> to vector<2x16x128xbf16>
    %11 = vector.extract_strided_slice %7 {offsets = [0, 128], sizes = [32, 128], strides = [1, 1]} : vector<32x384xf32> to vector<32x128xf32>
    %12 = vector.shape_cast %11 : vector<32x128xf32> to vector<2x16x128xf32>
    %13 = arith.truncf %12 : vector<2x16x128xf32> to vector<2x16x128xbf16>
    %14 = vector.extract_strided_slice %7 {offsets = [0, 256], sizes = [32, 128], strides = [1, 1]} : vector<32x384xf32> to vector<32x128xf32>
    %15 = vector.shape_cast %14 : vector<32x128xf32> to vector<2x16x128xf32>
    %16 = arith.truncf %15 : vector<2x16x128xf32> to vector<2x16x128xbf16>
    %cst_5 = arith.constant 0.000000e+00 : f32
    %17 = vector.broadcast %cst_5 : f32 to vector<32x128xf32>
    %18 = vector.extract_strided_slice %10 {offsets = [0, 0, 0], sizes = [2, 16, 32], strides = [1, 1, 1]} : vector<2x16x128xbf16> to vector<2x16x32xbf16>
    %19 = vector.extract_strided_slice %13 {offsets = [0, 0, 0], sizes = [2, 16, 32], strides = [1, 1, 1]} : vector<2x16x128xbf16> to vector<2x16x32xbf16>
    %20 = vector.extract_strided_slice %16 {offsets = [0, 0, 0], sizes = [2, 16, 32], strides = [1, 1, 1]} : vector<2x16x128xbf16> to vector<2x16x32xbf16>
    "tpu.trace_start"() <{level = 10 : i32, message = "bqd,bkd->bqk"}> : () -> ()
    %cst_6 = arith.constant dense<0.000000e+00> : vector<2x16x16xf32>
    %21 = tpu.matmul %18, %19, %cst_6 {dimension_numbers = #tpu.dot_dimension_numbers<[2], [2], [1], [1], [0, 0, 0, 1, 1, 1], [0], [0]>} : vector<2x16x32xbf16>, vector<2x16x32xbf16>, vector<2x16x16xf32> -> vector<2x16x16xf32>
    "tpu.trace_stop"() : () -> ()
    %cst_7 = arith.constant dense<0xFF800000> : vector<2x16xf32>
    %22 = vector.multi_reduction <maximumf>, %21, %cst_7 [2] : vector<2x16x16xf32> to vector<2x16xf32>
    %23 = vector.shape_cast %22 : vector<2x16xf32> to vector<2x16x1xf32>
    %24 = vector.broadcast %23 : vector<2x16x1xf32> to vector<2x16x16xf32>
    %25 = arith.subf %21, %24 : vector<2x16x16xf32>
    %26 = math.exp %25 : vector<2x16x16xf32>
    %cst_8 = arith.constant dense<0.000000e+00> : vector<2x16xf32>
    %27 = vector.multi_reduction <add>, %26, %cst_8 [2] : vector<2x16x16xf32> to vector<2x16xf32>
    %28 = vector.shape_cast %27 : vector<2x16xf32> to vector<2x16x1xf32>
    %29 = tpu.reciprocal %28 {approx = true} : vector<2x16x1xf32> -> vector<2x16x1xf32>
    %30 = vector.broadcast %29 : vector<2x16x1xf32> to vector<2x16x16xf32>
    %31 = arith.mulf %26, %30 : vector<2x16x16xf32>
    %32 = arith.truncf %31 : vector<2x16x16xf32> to vector<2x16x16xbf16>
    "tpu.trace_start"() <{level = 10 : i32, message = "bqk,bkd->bqd"}> : () -> ()
    %cst_9 = arith.constant dense<0.000000e+00> : vector<2x16x32xf32>
    %33 = tpu.matmul %32, %20, %cst_9 {dimension_numbers = #tpu.dot_dimension_numbers<[2], [1], [1], [2], [0, 0, 0, 1, 1, 2], [0], [0]>} : vector<2x16x16xbf16>, vector<2x16x32xbf16>, vector<2x16x32xf32> -> vector<2x16x32xf32>
    "tpu.trace_stop"() : () -> ()
    %34 = vector.shape_cast %33 : vector<2x16x32xf32> to vector<32x32xf32>
    %35 = arith.truncf %34 : vector<32x32xf32> to vector<32x32xbf16>
    %c0_10 = arith.constant 0 : index
    %c0_11 = arith.constant 0 : index
    %c0_12 = arith.constant 0 : index
    %36 = vector.load %arg4[%c0_10, %c0_11, %c0_12] : memref<1x128x128xbf16, #tpu.memory_space<vmem>>, vector<1x32x128xbf16>
    %37 = vector.shape_cast %36 : vector<1x32x128xbf16> to vector<32x128xbf16>
    %cst_13 = arith.constant dense<0.000000e+00> : vector<32x128xf32>
    %38 = tpu.matmul %35, %37, %cst_13 {dimension_numbers = #tpu.dot_dimension_numbers<[1], [0], [0], [1], [0, 0, 1, 1], [], []>} : vector<32x32xbf16>, vector<32x128xbf16>, vector<32x128xf32> -> vector<32x128xf32>
    %39 = arith.addf %17, %38 : vector<32x128xf32>
    %40 = vector.extract_strided_slice %10 {offsets = [0, 0, 32], sizes = [2, 16, 32], strides = [1, 1, 1]} : vector<2x16x128xbf16> to vector<2x16x32xbf16>
    %41 = vector.extract_strided_slice %13 {offsets = [0, 0, 32], sizes = [2, 16, 32], strides = [1, 1, 1]} : vector<2x16x128xbf16> to vector<2x16x32xbf16>
    %42 = vector.extract_strided_slice %16 {offsets = [0, 0, 32], sizes = [2, 16, 32], strides = [1, 1, 1]} : vector<2x16x128xbf16> to vector<2x16x32xbf16>
    "tpu.trace_start"() <{level = 10 : i32, message = "bqd,bkd->bqk"}> : () -> ()
    %cst_14 = arith.constant dense<0.000000e+00> : vector<2x16x16xf32>
    %43 = tpu.matmul %40, %41, %cst_14 {dimension_numbers = #tpu.dot_dimension_numbers<[2], [2], [1], [1], [0, 0, 0, 1, 1, 1], [0], [0]>} : vector<2x16x32xbf16>, vector<2x16x32xbf16>, vector<2x16x16xf32> -> vector<2x16x16xf32>
    "tpu.trace_stop"() : () -> ()
    %cst_15 = arith.constant dense<0xFF800000> : vector<2x16xf32>
    %44 = vector.multi_reduction <maximumf>, %43, %cst_15 [2] : vector<2x16x16xf32> to vector<2x16xf32>
    %45 = vector.shape_cast %44 : vector<2x16xf32> to vector<2x16x1xf32>
    %46 = vector.broadcast %45 : vector<2x16x1xf32> to vector<2x16x16xf32>
    %47 = arith.subf %43, %46 : vector<2x16x16xf32>
    %48 = math.exp %47 : vector<2x16x16xf32>
    %cst_16 = arith.constant dense<0.000000e+00> : vector<2x16xf32>
    %49 = vector.multi_reduction <add>, %48, %cst_16 [2] : vector<2x16x16xf32> to vector<2x16xf32>
    %50 = vector.shape_cast %49 : vector<2x16xf32> to vector<2x16x1xf32>
    %51 = tpu.reciprocal %50 {approx = true} : vector<2x16x1xf32> -> vector<2x16x1xf32>
    %52 = vector.broadcast %51 : vector<2x16x1xf32> to vector<2x16x16xf32>
    %53 = arith.mulf %48, %52 : vector<2x16x16xf32>
    %54 = arith.truncf %53 : vector<2x16x16xf32> to vector<2x16x16xbf16>
    "tpu.trace_start"() <{level = 10 : i32, message = "bqk,bkd->bqd"}> : () -> ()
    %cst_17 = arith.constant dense<0.000000e+00> : vector<2x16x32xf32>
    %55 = tpu.matmul %54, %42, %cst_17 {dimension_numbers = #tpu.dot_dimension_numbers<[2], [1], [1], [2], [0, 0, 0, 1, 1, 2], [0], [0]>} : vector<2x16x16xbf16>, vector<2x16x32xbf16>, vector<2x16x32xf32> -> vector<2x16x32xf32>
    "tpu.trace_stop"() : () -> ()
    %56 = vector.shape_cast %55 : vector<2x16x32xf32> to vector<32x32xf32>
    %57 = arith.truncf %56 : vector<32x32xf32> to vector<32x32xbf16>
    %c0_18 = arith.constant 0 : index
    %c32 = arith.constant 32 : index
    %c0_19 = arith.constant 0 : index
    %58 = vector.load %arg4[%c0_18, %c32, %c0_19] : memref<1x128x128xbf16, #tpu.memory_space<vmem>>, vector<1x32x128xbf16>
    %59 = vector.shape_cast %58 : vector<1x32x128xbf16> to vector<32x128xbf16>
    %cst_20 = arith.constant dense<0.000000e+00> : vector<32x128xf32>
    %60 = tpu.matmul %57, %59, %cst_20 {dimension_numbers = #tpu.dot_dimension_numbers<[1], [0], [0], [1], [0, 0, 1, 1], [], []>} : vector<32x32xbf16>, vector<32x128xbf16>, vector<32x128xf32> -> vector<32x128xf32>
    %61 = arith.addf %39, %60 : vector<32x128xf32>
    %62 = vector.extract_strided_slice %10 {offsets = [0, 0, 64], sizes = [2, 16, 32], strides = [1, 1, 1]} : vector<2x16x128xbf16> to vector<2x16x32xbf16>
    %63 = vector.extract_strided_slice %13 {offsets = [0, 0, 64], sizes = [2, 16, 32], strides = [1, 1, 1]} : vector<2x16x128xbf16> to vector<2x16x32xbf16>
    %64 = vector.extract_strided_slice %16 {offsets = [0, 0, 64], sizes = [2, 16, 32], strides = [1, 1, 1]} : vector<2x16x128xbf16> to vector<2x16x32xbf16>
    "tpu.trace_start"() <{level = 10 : i32, message = "bqd,bkd->bqk"}> : () -> ()
    %cst_21 = arith.constant dense<0.000000e+00> : vector<2x16x16xf32>
    %65 = tpu.matmul %62, %63, %cst_21 {dimension_numbers = #tpu.dot_dimension_numbers<[2], [2], [1], [1], [0, 0, 0, 1, 1, 1], [0], [0]>} : vector<2x16x32xbf16>, vector<2x16x32xbf16>, vector<2x16x16xf32> -> vector<2x16x16xf32>
    "tpu.trace_stop"() : () -> ()
    %cst_22 = arith.constant dense<0xFF800000> : vector<2x16xf32>
    %66 = vector.multi_reduction <maximumf>, %65, %cst_22 [2] : vector<2x16x16xf32> to vector<2x16xf32>
    %67 = vector.shape_cast %66 : vector<2x16xf32> to vector<2x16x1xf32>
    %68 = vector.broadcast %67 : vector<2x16x1xf32> to vector<2x16x16xf32>
    %69 = arith.subf %65, %68 : vector<2x16x16xf32>
    %70 = math.exp %69 : vector<2x16x16xf32>
    %cst_23 = arith.constant dense<0.000000e+00> : vector<2x16xf32>
    %71 = vector.multi_reduction <add>, %70, %cst_23 [2] : vector<2x16x16xf32> to vector<2x16xf32>
    %72 = vector.shape_cast %71 : vector<2x16xf32> to vector<2x16x1xf32>
    %73 = tpu.reciprocal %72 {approx = true} : vector<2x16x1xf32> -> vector<2x16x1xf32>
    %74 = vector.broadcast %73 : vector<2x16x1xf32> to vector<2x16x16xf32>
    %75 = arith.mulf %70, %74 : vector<2x16x16xf32>
    %76 = arith.truncf %75 : vector<2x16x16xf32> to vector<2x16x16xbf16>
    "tpu.trace_start"() <{level = 10 : i32, message = "bqk,bkd->bqd"}> : () -> ()
    %cst_24 = arith.constant dense<0.000000e+00> : vector<2x16x32xf32>
    %77 = tpu.matmul %76, %64, %cst_24 {dimension_numbers = #tpu.dot_dimension_numbers<[2], [1], [1], [2], [0, 0, 0, 1, 1, 2], [0], [0]>} : vector<2x16x16xbf16>, vector<2x16x32xbf16>, vector<2x16x32xf32> -> vector<2x16x32xf32>
    "tpu.trace_stop"() : () -> ()
    %78 = vector.shape_cast %77 : vector<2x16x32xf32> to vector<32x32xf32>
    %79 = arith.truncf %78 : vector<32x32xf32> to vector<32x32xbf16>
    %c0_25 = arith.constant 0 : index
    %c64 = arith.constant 64 : index
    %c0_26 = arith.constant 0 : index
    %80 = vector.load %arg4[%c0_25, %c64, %c0_26] : memref<1x128x128xbf16, #tpu.memory_space<vmem>>, vector<1x32x128xbf16>
    %81 = vector.shape_cast %80 : vector<1x32x128xbf16> to vector<32x128xbf16>
    %cst_27 = arith.constant dense<0.000000e+00> : vector<32x128xf32>
    %82 = tpu.matmul %79, %81, %cst_27 {dimension_numbers = #tpu.dot_dimension_numbers<[1], [0], [0], [1], [0, 0, 1, 1], [], []>} : vector<32x32xbf16>, vector<32x128xbf16>, vector<32x128xf32> -> vector<32x128xf32>
    %83 = arith.addf %61, %82 : vector<32x128xf32>
    %84 = vector.extract_strided_slice %10 {offsets = [0, 0, 96], sizes = [2, 16, 32], strides = [1, 1, 1]} : vector<2x16x128xbf16> to vector<2x16x32xbf16>
    %85 = vector.extract_strided_slice %13 {offsets = [0, 0, 96], sizes = [2, 16, 32], strides = [1, 1, 1]} : vector<2x16x128xbf16> to vector<2x16x32xbf16>
    %86 = vector.extract_strided_slice %16 {offsets = [0, 0, 96], sizes = [2, 16, 32], strides = [1, 1, 1]} : vector<2x16x128xbf16> to vector<2x16x32xbf16>
    "tpu.trace_start"() <{level = 10 : i32, message = "bqd,bkd->bqk"}> : () -> ()
    %cst_28 = arith.constant dense<0.000000e+00> : vector<2x16x16xf32>
    %87 = tpu.matmul %84, %85, %cst_28 {dimension_numbers = #tpu.dot_dimension_numbers<[2], [2], [1], [1], [0, 0, 0, 1, 1, 1], [0], [0]>} : vector<2x16x32xbf16>, vector<2x16x32xbf16>, vector<2x16x16xf32> -> vector<2x16x16xf32>
    "tpu.trace_stop"() : () -> ()
    %cst_29 = arith.constant dense<0xFF800000> : vector<2x16xf32>
    %88 = vector.multi_reduction <maximumf>, %87, %cst_29 [2] : vector<2x16x16xf32> to vector<2x16xf32>
    %89 = vector.shape_cast %88 : vector<2x16xf32> to vector<2x16x1xf32>
    %90 = vector.broadcast %89 : vector<2x16x1xf32> to vector<2x16x16xf32>
    %91 = arith.subf %87, %90 : vector<2x16x16xf32>
    %92 = math.exp %91 : vector<2x16x16xf32>
    %cst_30 = arith.constant dense<0.000000e+00> : vector<2x16xf32>
    %93 = vector.multi_reduction <add>, %92, %cst_30 [2] : vector<2x16x16xf32> to vector<2x16xf32>
    %94 = vector.shape_cast %93 : vector<2x16xf32> to vector<2x16x1xf32>
    %95 = tpu.reciprocal %94 {approx = true} : vector<2x16x1xf32> -> vector<2x16x1xf32>
    %96 = vector.broadcast %95 : vector<2x16x1xf32> to vector<2x16x16xf32>
    %97 = arith.mulf %92, %96 : vector<2x16x16xf32>
    %98 = arith.truncf %97 : vector<2x16x16xf32> to vector<2x16x16xbf16>
    "tpu.trace_start"() <{level = 10 : i32, message = "bqk,bkd->bqd"}> : () -> ()
    %cst_31 = arith.constant dense<0.000000e+00> : vector<2x16x32xf32>
    %99 = tpu.matmul %98, %86, %cst_31 {dimension_numbers = #tpu.dot_dimension_numbers<[2], [1], [1], [2], [0, 0, 0, 1, 1, 2], [0], [0]>} : vector<2x16x16xbf16>, vector<2x16x32xbf16>, vector<2x16x32xf32> -> vector<2x16x32xf32>
    "tpu.trace_stop"() : () -> ()
    %100 = vector.shape_cast %99 : vector<2x16x32xf32> to vector<32x32xf32>
    %101 = arith.truncf %100 : vector<32x32xf32> to vector<32x32xbf16>
    %c0_32 = arith.constant 0 : index
    %c96 = arith.constant 96 : index
    %c0_33 = arith.constant 0 : index
    %102 = vector.load %arg4[%c0_32, %c96, %c0_33] : memref<1x128x128xbf16, #tpu.memory_space<vmem>>, vector<1x32x128xbf16>
    %103 = vector.shape_cast %102 : vector<1x32x128xbf16> to vector<32x128xbf16>
    %cst_34 = arith.constant dense<0.000000e+00> : vector<32x128xf32>
    %104 = tpu.matmul %101, %103, %cst_34 {dimension_numbers = #tpu.dot_dimension_numbers<[1], [0], [0], [1], [0, 0, 1, 1], [], []>} : vector<32x32xbf16>, vector<32x128xbf16>, vector<32x128xf32> -> vector<32x128xf32>
    %105 = arith.addf %83, %104 : vector<32x128xf32>
    %c0_35 = arith.constant 0 : index
    %c0_36 = arith.constant 0 : index
    %c0_37 = arith.constant 0 : index
    %106 = vector.load %arg5[%c0_35, %c0_36, %c0_37] : memref<1x1x128xf32, #tpu.memory_space<vmem>>, vector<1x1x128xf32>
    %107 = vector.shape_cast %106 : vector<1x1x128xf32> to vector<1x128xf32>
    %108 = vector.broadcast %107 : vector<1x128xf32> to vector<32x128xf32>
    %109 = arith.addf %105, %108 : vector<32x128xf32>
    %110 = arith.addf %109, %3 : vector<32x128xf32>
    %c0_38 = arith.constant 0 : index
    %c0_39 = arith.constant 0 : index
    %c0_40 = arith.constant 0 : index
    %111 = vector.load %arg6[%c0_38, %c0_39, %c0_40] : memref<1x1x128xf32, #tpu.memory_space<vmem>>, vector<1x1x128xf32>
    %112 = vector.shape_cast %111 : vector<1x1x128xf32> to vector<1x128xf32>
    %c0_41 = arith.constant 0 : index
    %c0_42 = arith.constant 0 : index
    %c0_43 = arith.constant 0 : index
    %113 = vector.load %arg7[%c0_41, %c0_42, %c0_43] : memref<1x1x128xf32, #tpu.memory_space<vmem>>, vector<1x1x128xf32>
    %114 = vector.shape_cast %113 : vector<1x1x128xf32> to vector<1x128xf32>
    %cst_44 = arith.constant dense<0.000000e+00> : vector<32xf32>
    %115 = vector.multi_reduction <add>, %110, %cst_44 [1] : vector<32x128xf32> to vector<32xf32>
    %116 = vector.shape_cast %115 : vector<32xf32> to vector<32x1xf32>
    %cst_45 = arith.constant 1.280000e+02 : f32
    %117 = vector.broadcast %cst_45 : f32 to vector<32x1xf32>
    %118 = arith.divf %116, %117 : vector<32x1xf32>
    %119 = vector.broadcast %118 : vector<32x1xf32> to vector<32x128xf32>
    %120 = arith.subf %110, %119 : vector<32x128xf32>
    %121 = arith.mulf %120, %120 : vector<32x128xf32>
    %cst_46 = arith.constant dense<0.000000e+00> : vector<32xf32>
    %122 = vector.multi_reduction <add>, %121, %cst_46 [1] : vector<32x128xf32> to vector<32xf32>
    %123 = vector.shape_cast %122 : vector<32xf32> to vector<32x1xf32>
    %cst_47 = arith.constant 1.280000e+02 : f32
    %124 = vector.broadcast %cst_47 : f32 to vector<32x1xf32>
    %125 = arith.divf %123, %124 : vector<32x1xf32>
    %126 = vector.broadcast %118 : vector<32x1xf32> to vector<32x128xf32>
    %127 = arith.subf %110, %126 : vector<32x128xf32>
    %cst_48 = arith.constant 9.99999974E-6 : f32
    %128 = vector.broadcast %cst_48 : f32 to vector<32x1xf32>
    %129 = arith.addf %125, %128 : vector<32x1xf32>
    %130 = math.rsqrt %129 : vector<32x1xf32>
    %131 = vector.broadcast %130 : vector<32x1xf32> to vector<32x128xf32>
    %132 = arith.mulf %127, %131 : vector<32x128xf32>
    %133 = vector.broadcast %112 : vector<1x128xf32> to vector<32x128xf32>
    %134 = arith.mulf %132, %133 : vector<32x128xf32>
    %135 = vector.broadcast %114 : vector<1x128xf32> to vector<32x128xf32>
    %136 = arith.addf %134, %135 : vector<32x128xf32>
    %137 = arith.truncf %136 : vector<32x128xf32> to vector<32x128xbf16>
    %c0_49 = arith.constant 0 : index
    %c0_50 = arith.constant 0 : index
    %c0_51 = arith.constant 0 : index
    %138 = vector.load %arg8[%c0_49, %c0_50, %c0_51] : memref<1x128x512xbf16, #tpu.memory_space<vmem>>, vector<1x128x512xbf16>
    %139 = vector.shape_cast %138 : vector<1x128x512xbf16> to vector<128x512xbf16>
    %cst_52 = arith.constant dense<0.000000e+00> : vector<32x512xf32>
    %140 = tpu.matmul %137, %139, %cst_52 {dimension_numbers = #tpu.dot_dimension_numbers<[1], [0], [0], [1], [0, 0, 1, 1], [], []>} : vector<32x128xbf16>, vector<128x512xbf16>, vector<32x512xf32> -> vector<32x512xf32>
    %c0_53 = arith.constant 0 : index
    %c0_54 = arith.constant 0 : index
    %c0_55 = arith.constant 0 : index
    %141 = vector.load %arg9[%c0_53, %c0_54, %c0_55] : memref<1x1x512xf32, #tpu.memory_space<vmem>>, vector<1x1x512xf32>
    %142 = vector.shape_cast %141 : vector<1x1x512xf32> to vector<1x512xf32>
    %143 = vector.broadcast %142 : vector<1x512xf32> to vector<32x512xf32>
    %144 = arith.addf %140, %143 : vector<32x512xf32>
    %cst_56 = arith.constant 0.000000e+00 : f32
    %145 = vector.broadcast %cst_56 : f32 to vector<32x512xf32>
    %146 = arith.maximumf %144, %145 : vector<32x512xf32>
    %147 = arith.truncf %146 : vector<32x512xf32> to vector<32x512xbf16>
    %c0_57 = arith.constant 0 : index
    %c0_58 = arith.constant 0 : index
    %c0_59 = arith.constant 0 : index
    %148 = vector.load %arg10[%c0_57, %c0_58, %c0_59] : memref<1x512x128xbf16, #tpu.memory_space<vmem>>, vector<1x512x128xbf16>
    %149 = vector.shape_cast %148 : vector<1x512x128xbf16> to vector<512x128xbf16>
    %cst_60 = arith.constant dense<0.000000e+00> : vector<32x128xf32>
    %150 = tpu.matmul %147, %149, %cst_60 {dimension_numbers = #tpu.dot_dimension_numbers<[1], [0], [0], [1], [0, 0, 1, 1], [], []>} : vector<32x512xbf16>, vector<512x128xbf16>, vector<32x128xf32> -> vector<32x128xf32>
    %c0_61 = arith.constant 0 : index
    %c0_62 = arith.constant 0 : index
    %c0_63 = arith.constant 0 : index
    %151 = vector.load %arg11[%c0_61, %c0_62, %c0_63] : memref<1x1x128xf32, #tpu.memory_space<vmem>>, vector<1x1x128xf32>
    %152 = vector.shape_cast %151 : vector<1x1x128xf32> to vector<1x128xf32>
    %153 = vector.broadcast %152 : vector<1x128xf32> to vector<32x128xf32>
    %154 = arith.addf %150, %153 : vector<32x128xf32>
    %155 = arith.addf %154, %136 : vector<32x128xf32>
    %c0_64 = arith.constant 0 : index
    %c0_65 = arith.constant 0 : index
    %c0_66 = arith.constant 0 : index
    %156 = vector.load %arg12[%c0_64, %c0_65, %c0_66] : memref<1x1x128xf32, #tpu.memory_space<vmem>>, vector<1x1x128xf32>
    %157 = vector.shape_cast %156 : vector<1x1x128xf32> to vector<1x128xf32>
    %c0_67 = arith.constant 0 : index
    %c0_68 = arith.constant 0 : index
    %c0_69 = arith.constant 0 : index
    %158 = vector.load %arg13[%c0_67, %c0_68, %c0_69] : memref<1x1x128xf32, #tpu.memory_space<vmem>>, vector<1x1x128xf32>
    %159 = vector.shape_cast %158 : vector<1x1x128xf32> to vector<1x128xf32>
    %cst_70 = arith.constant dense<0.000000e+00> : vector<32xf32>
    %160 = vector.multi_reduction <add>, %155, %cst_70 [1] : vector<32x128xf32> to vector<32xf32>
    %161 = vector.shape_cast %160 : vector<32xf32> to vector<32x1xf32>
    %cst_71 = arith.constant 1.280000e+02 : f32
    %162 = vector.broadcast %cst_71 : f32 to vector<32x1xf32>
    %163 = arith.divf %161, %162 : vector<32x1xf32>
    %164 = vector.broadcast %163 : vector<32x1xf32> to vector<32x128xf32>
    %165 = arith.subf %155, %164 : vector<32x128xf32>
    %166 = arith.mulf %165, %165 : vector<32x128xf32>
    %cst_72 = arith.constant dense<0.000000e+00> : vector<32xf32>
    %167 = vector.multi_reduction <add>, %166, %cst_72 [1] : vector<32x128xf32> to vector<32xf32>
    %168 = vector.shape_cast %167 : vector<32xf32> to vector<32x1xf32>
    %cst_73 = arith.constant 1.280000e+02 : f32
    %169 = vector.broadcast %cst_73 : f32 to vector<32x1xf32>
    %170 = arith.divf %168, %169 : vector<32x1xf32>
    %171 = vector.broadcast %163 : vector<32x1xf32> to vector<32x128xf32>
    %172 = arith.subf %155, %171 : vector<32x128xf32>
    %cst_74 = arith.constant 9.99999974E-6 : f32
    %173 = vector.broadcast %cst_74 : f32 to vector<32x1xf32>
    %174 = arith.addf %170, %173 : vector<32x1xf32>
    %175 = math.rsqrt %174 : vector<32x1xf32>
    %176 = vector.broadcast %175 : vector<32x1xf32> to vector<32x128xf32>
    %177 = arith.mulf %172, %176 : vector<32x128xf32>
    %178 = vector.broadcast %157 : vector<1x128xf32> to vector<32x128xf32>
    %179 = arith.mulf %177, %178 : vector<32x128xf32>
    %180 = vector.broadcast %159 : vector<1x128xf32> to vector<32x128xf32>
    %181 = arith.addf %179, %180 : vector<32x128xf32>
    %c0_75 = arith.constant 0 : index
    %c0_76 = arith.constant 0 : index
    %182 = vector.load %arg15[%c0_75, %c0_76] : memref<32x128xf32, #tpu.memory_space<vmem>>, vector<32x128xf32>
    tpu.vector_store %arg15[%c0_75, %c0_76], %181 {strides = array<i32>} : memref<32x128xf32, #tpu.memory_space<vmem>>, vector<32x128xf32>,
    %c1_i32 = arith.constant 1 : i32
    %183 = arith.cmpi eq, %arg1, %c1_i32 : i32
    %184 = arith.extui %183 : i1 to i32
    %c0_i32_77 = arith.constant 0 : i32
    %185 = arith.cmpi ne, %184, %c0_i32_77 : i32
    scf.if %185 {
      %186 = vector.shape_cast %181 : vector<32x128xf32> to vector<2x16x128xf32>
      %187 = arith.truncf %186 : vector<2x16x128xf32> to vector<2x16x128xbf16>
      %c0_78 = arith.constant 0 : index
      %c0_79 = arith.constant 0 : index
      %c0_80 = arith.constant 0 : index
      %188 = vector.load %arg14[%c0_78, %c0_79, %c0_80] : memref<2x16x128xbf16, #tpu.memory_space<vmem>>, vector<2x16x128xbf16>
      tpu.vector_store %arg14[%c0_78, %c0_79, %c0_80], %187 {strides = array<i32>} : memref<2x16x128xbf16, #tpu.memory_space<vmem>>, vector<2x16x128xbf16>,
    } else {
    }
    return
  }
  func.func @transform_0(%arg0: i32, %arg1: i32) -> (i32, i32, i32) {
    %c0_i32 = arith.constant 0 : i32
    %c0_i32_0 = arith.constant 0 : i32
    %c0_i32_1 = arith.constant 0 : i32
    return %arg0, %c0_i32, %c0_i32_0 : i32, i32, i32
  }
  func.func @transform_1(%arg0: i32, %arg1: i32) -> (i32, i32, i32) {
    %c0_i32 = arith.constant 0 : i32
    %c0_i32_0 = arith.constant 0 : i32
    %c0_i32_1 = arith.constant 0 : i32
    return %arg1, %c0_i32, %c0_i32_0 : i32, i32, i32
  }
  func.func @transform_2(%arg0: i32, %arg1: i32) -> (i32, i32, i32) {
    %c0_i32 = arith.constant 0 : i32
    %c0_i32_0 = arith.constant 0 : i32
    %c0_i32_1 = arith.constant 0 : i32
    return %arg1, %c0_i32, %c0_i32_0 : i32, i32, i32
  }
  func.func @transform_3(%arg0: i32, %arg1: i32) -> (i32, i32, i32) {
    %c0_i32 = arith.constant 0 : i32
    %c0_i32_0 = arith.constant 0 : i32
    %c0_i32_1 = arith.constant 0 : i32
    return %arg1, %c0_i32, %c0_i32_0 : i32, i32, i32
  }
  func.func @transform_4(%arg0: i32, %arg1: i32) -> (i32, i32, i32) {
    %c0_i32 = arith.constant 0 : i32
    %c0_i32_0 = arith.constant 0 : i32
    %c0_i32_1 = arith.constant 0 : i32
    return %arg1, %c0_i32, %c0_i32_0 : i32, i32, i32
  }
  func.func @transform_5(%arg0: i32, %arg1: i32) -> (i32, i32, i32) {
    %c0_i32 = arith.constant 0 : i32
    %c0_i32_0 = arith.constant 0 : i32
    %c0_i32_1 = arith.constant 0 : i32
    return %arg1, %c0_i32, %c0_i32_0 : i32, i32, i32
  }
  func.func @transform_6(%arg0: i32, %arg1: i32) -> (i32, i32, i32) {
    %c0_i32 = arith.constant 0 : i32
    %c0_i32_0 = arith.constant 0 : i32
    %c0_i32_1 = arith.constant 0 : i32
    return %arg1, %c0_i32, %c0_i32_0 : i32, i32, i32
  }
  func.func @transform_7(%arg0: i32, %arg1: i32) -> (i32, i32, i32) {
    %c0_i32 = arith.constant 0 : i32
    %c0_i32_0 = arith.constant 0 : i32
    %c0_i32_1 = arith.constant 0 : i32
    return %arg1, %c0_i32, %c0_i32_0 : i32, i32, i32
  }
  func.func @transform_8(%arg0: i32, %arg1: i32) -> (i32, i32, i32) {
    %c0_i32 = arith.constant 0 : i32
    %c0_i32_0 = arith.constant 0 : i32
    %c0_i32_1 = arith.constant 0 : i32
    return %arg1, %c0_i32, %c0_i32_0 : i32, i32, i32
  }
  func.func @transform_9(%arg0: i32, %arg1: i32) -> (i32, i32, i32) {
    %c0_i32 = arith.constant 0 : i32
    %c0_i32_0 = arith.constant 0 : i32
    %c0_i32_1 = arith.constant 0 : i32
    return %arg1, %c0_i32, %c0_i32_0 : i32, i32, i32
  }
  func.func @transform_10(%arg0: i32, %arg1: i32) -> (i32, i32, i32) {
    %c0_i32 = arith.constant 0 : i32
    %c0_i32_0 = arith.constant 0 : i32
    %c0_i32_1 = arith.constant 0 : i32
    return %arg1, %c0_i32, %c0_i32_0 : i32, i32, i32
  }
  func.func @transform_11(%arg0: i32, %arg1: i32) -> (i32, i32, i32) {
    %c0_i32 = arith.constant 0 : i32
    %c0_i32_0 = arith.constant 0 : i32
    %c0_i32_1 = arith.constant 0 : i32
    return %arg1, %c0_i32, %c0_i32_0 : i32, i32, i32
  }
  func.func @transform_12(%arg0: i32, %arg1: i32) -> (i32, i32, i32) {
    %c0_i32 = arith.constant 0 : i32
    %c0_i32_0 = arith.constant 0 : i32
    %c0_i32_1 = arith.constant 0 : i32
    return %arg0, %c0_i32, %c0_i32_0 : i32, i32, i32
  }
}

</mosaic_0001>

<bundles_post_ra>
// kernel: tpu_custom_call.1
= control target key start
LH: loop header
LB: loop body
LE: loop exit
PB: predicated region body
PF: predicated region fallthrough
CT: control target
= control target key end

     0   :  { %s5427_s0 = inlined_call_operand.hbm [shape: bf16[4,16,128], index: 0, kind: input, shape index: {}]   ;;  %s5428_s1 = inlined_call_operand.hbm [shape: bf16[2,128,384], index: 1, kind: input, shape index: {}]   ;;  %s5429_s2 = inlined_call_operand.hbm [shape: bf16[2,128,128], index: 2, kind: input, shape index: {}]   ;;  %s5430_s3 = inlined_call_operand.vmem [shape: f32[2,1,128], index: 3, kind: input, shape index: {}]   ;;  %s5431_s4 = inlined_call_operand.vmem [shape: f32[2,1,128], index: 4, kind: input, shape index: {}]   ;;  %s5432_s5 = inlined_call_operand.vmem [shape: f32[2,1,128], index: 5, kind: input, shape index: {}]   ;;  %s5433_s6 = inlined_call_operand.hbm [shape: bf16[2,128,512], index: 6, kind: input, shape index: {}]   ;;  %s5434_s7 = inlined_call_operand.vmem [shape: f32[2,1,512], index: 7, kind: input, shape index: {}]   ;;  %s5435_s8 = inlined_call_operand.hbm [shape: bf16[2,512,128], index: 8, kind: input, shape index: {}]   ;;  %s5436_s9 = inlined_call_operand.vmem [shape: f32[2,1,128], index: 9, kind: input, shape index: {}]   ;;  %s5437_s10 = inlined_call_operand.vmem [shape: f32[2,1,128], index: 10, kind: input, shape index: {}]   ;;  %s5438_s11 = inlined_call_operand.vmem [shape: f32[2,1,128], index: 11, kind: input, shape index: {}]   ;;  %s5439_s12 = inlined_call_operand.hbm [shape: bf16[4,16,128], index: 12, kind: output, shape index: {}]  }
   0x1   :  { %5466 = sst [smem:[#allocation33_spill]] %s5427_s0 }
   0x2   :  { %5467 = sst [smem:[#allocation34_spill]] %s5428_s1 }
   0x3   :  { %5468 = sst [smem:[#allocation35_spill]] %s5429_s2 }
   0x4   :  { %5469 = sst [smem:[#allocation36_spill]] %s5430_s3 }
   0x5   :  { %5470 = sst [smem:[#allocation37_spill]] %s5431_s4 }
   0x6   :  { %5471 = sst [smem:[#allocation38_spill]] %s5432_s5 }
   0x7   :  { %5472 = sst [smem:[#allocation39_spill]] %s5433_s6 }
   0x8   :  { %5473 = sst [smem:[#allocation40_spill]] %s5434_s7 }
   0x9   :  { %5474 = sst [smem:[#allocation41_spill]] %s5435_s8 }
   0xa   :  { %5475 = sst [smem:[#allocation42_spill]] %s5436_s9 }
   0xb   :  { %5476 = sst [smem:[#allocation43_spill]] %s5437_s10 }
   0xc   :  { %5477 = sst [smem:[#allocation44_spill]] %s5438_s11 }
   0xd   :  { %5478 = sst [smem:[#allocation45_spill]] %s5439_s12 }
   0xe   :  { %17 = vsyncpa [#allocation4], 0 }
   0xf   :  { %19 = vsyncpa [#allocation4 + $0x1], 0 }
  0x10   :  { %20 = vsyncpa [#allocation7], 0 }
  0x11   :  { %22 = vsyncpa [#allocation7 + $0x1], 0 }
  0x12   :  { %23 = vsyncpa [#allocation10], 0 }
  0x13   :  { %25 = vsyncpa [#allocation10 + $0x1], 0 }
  0x14   :  { %26 = vsyncpa [#allocation5], 0 }
  0x15   :  { %28 = vsyncpa [#allocation5 + $0x1], 0  ;;  %s4569_s21 = smov 0   ;;  %s4571_s22 = smov 0  }
  0x16   :  { %s4573_s23 = smov 0   ;;  %s4575_s24 = smov 0  }
  0x17   :  { %s4577_s25 = smov 0   ;;  %s4579_s26 = smov 0  }
  0x18   :  { %s4581_s27 = smov 0   ;;  %s4583_s28 = smov 0  }
  0x19   :  { %s4585_s29 = smov 0   ;;  %s4587_s30 = smov 0  }
  0x1a   :  { %s4589_s13 = smov 0  }
  0x1b LB: > { %5479 = sst [smem:[#allocation17_spill]] %s4447_s22  ;;  %s43_s14 = sadd.s32 1, %s4475_s29  ;;  %s4483_s13 = sphi %s4589_s13, %s34_s13   ;;  %s4479_s30 = sphi %s4587_s30, %s5556_s30   ;;  %s4475_s29 = sphi %s4585_s29, %s5555_s29   ;;  %s4471_s28 = sphi %s4583_s28, %s5554_s28   ;;  %s4467_s27 = sphi %s4581_s27, %s5553_s27   ;;  %s4463_s26 = sphi %s4579_s26, %s5552_s26   ;;  %s4459_s25 = sphi %s4577_s25, %s5551_s25   ;;  %s4455_s24 = sphi %s4575_s24, %s5550_s24   ;;  %s4451_s23 = sphi %s4573_s23, %s5549_s23   ;;  %s4447_s22 = sphi %s4571_s22, %s5548_s22   ;;  %s4443_s21 = sphi %s4569_s21, %s5547_s21  }
  0x1c   : > { %5480 = sst [smem:[#allocation18_spill]] %s4451_s23  ;;  %p5445_p0 = scmp.eq.s32.totalorder %s4483_s13, 0 }
  0x1d   : > { %5481 = sst [smem:[#allocation19_spill]] %s4455_s24  ;;  %p4626_p1 = scmp.ge.s32.totalorder %s43_s14, 2 }
  0x1e   : > { %5482 = sst [smem:[#allocation20_spill]] %s4459_s25  ;;  %s79_s16 = sadd.s32 1, %s4451_s23 }
  0x1f   : > { %5483 = sst [smem:[#allocation21_spill]] %s4463_s26  ;;  %p86_p2 = scmp.ne.s32.totalorder %s4451_s23, %s4447_s22 }
  0x20   : > { %5484 = sst [smem:[#allocation22_spill]] %s4467_s27  ;;  %s5558_s14 = smov (%p4626_p1, %s43_s14), 0 }
  0x21   : > { %5485 = sst [smem:[#allocation23_spill]] %s4471_s28  ;;  %p88_p4 = por %p86_p2, %p5445_p0 }
  0x22   : > { %5486 = sst [smem:[#allocation24_spill]] %s4475_s29  ;;  %s76_s17 = ssub.s32 %s4475_s29, %s5558_s14 }
  0x23   : > { %5487 = sst [smem:[#allocation25_spill]] %s4479_s30  ;;  %p5443_p5 = scmp.lt.s32.totalorder %s4483_s13, 4 }
  0x24   : > { %s5488_s15 = scalar_select %p4626_p1, 1, 0 }
  0x25   : > { %5489 = sst [smem:[#allocation26_spill]] %s5558_s14  ;;  %p77_p6 = scmp.eq.s32.totalorder %s76_s17, 0 }
  0x26   : > { %s5444_s18 = sand.u32 1, %s4483_s13   ;;  %s4646_s19 = sand.u32 1, %s4451_s23  }
  0x27   : > { %s4649_s20 = scalar_select %p77_p6, %s4451_s23, %s79_s16  }
  0x28   : > { %s3861_s12 = smul.u32 192, %s4646_s19  ;;  %p4654_p7 = pnand %p5443_p5, %p88_p4 }
  0x29   : > { %5490 = sst [smem:[#allocation27_spill]] %s4649_s20  ;;  %s3862_s11 = smul.u32 3072, %s4475_s29 }
  0x2a   : > { %s5491_s28 = scalar_select %p4654_p7, 1, 0 }
  0x2b   : > { %s5492_s1 = sld [smem:[#allocation34_spill]]  ;;  %s428_s17 = scalar_lea.vmem [#allocation6], %s3861_s12 }
  0x2c   : > { %s435_s16 = sshll.u32 %s428_s17, 4  ;;  %s4668_s20 = scalar_lea.sflag [#allocation7], %s5444_s18  ;;  %s4664_s16 = int_to_ptr.vmem [resolvable:$true] %s435_s16 }
  0x2d   : > { %p4674_p9 = pneg %p4654_p7 }
  0x31   : > { %s4662_s14 = scalar_lea.hbm %s5492_s1, %s3862_s11  ;;  %s4208_s11 = scalar_lea.hbm %s5492_s1, 6144 }
  0x32   : > { %s4203_s23 = scalar_lea.hbm %s4662_s14, 3072  ;;  %p4209_p12 = scmp.lt.u32.totalorder %s4662_s14, %s5492_s1 }
  0x33   : > { %p4204_p8 = scmp.ne.s32.totalorder %s4662_s14, %s4203_s23  ;;  %p4210_p13 = scmp.lt.u32.totalorder %s4208_s11, %s4203_s23 }
  0x34   : > { %p4212_p4 = scmp.lt.u32.totalorder %s4203_s23, %s4662_s14 }
  0x35   : > { %p4206_p10 = pnand %p4674_p9, %p4204_p8  ;;  %p4211_p2 = por %p4210_p13, %p4209_p12 }
  0x37   : > { %p4207_p11 = pneg %p4206_p10  ;;  %p4213_p6 = por %p4212_p4, %p4211_p2 }
  0x39   : > { %p4214_p5 = pnand %p4213_p6, %p4207_p11 }
  0x3b   : > { %4217 = shalt.err (!%p4214_p5)
}
  0x3c   : > { %s4218_s18 = scalar_lea.vmem %s4664_s16, 3072  ;;  %s4485_s9 = smov [#allocation6]  }
  0x3d   : > { %p4219_p8 = scmp.ne.s32.totalorder %s4664_s16, %s4218_s18  ;;  %s4223_s10 = sshll.u32 %s4485_s9, 4  ;;  %s4224_s10 = int_to_ptr.vmem [resolvable:$false] %s4223_s10 }
  0x3e   : > { %s4225_s12 = scalar_lea.vmem %s4224_s10, 6144  ;;  %p4226_p0 = scmp.lt.s32.totalorder %s4664_s16, %s4224_s10 }
  0x3f   : > { %p4221_p10 = pnand %p4219_p8, %p4674_p9  ;;  %p4227_p1 = scmp.lt.s32.totalorder %s4225_s12, %s4218_s18 }
  0x41   : > { %p4222_p3 = pneg %p4221_p10  ;;  %p4228_p12 = por %p4227_p1, %p4226_p0 }
  0x43   : > { %p4229_p13 = pnand %p4228_p12, %p4222_p3 }
  0x45   : > { %4232 = shalt.err (!%p4229_p13)
}
  0x46   : > { %s4486_s23 = smov 192   ;;  %s4487_s11 = smov 12  }
  0x47   : > { %3882 = dma.hbm_to_vmem [thread:$0]  (!%p4654_p7), %s4662_s14, 3072, %s4664_s16, %s4668_s20, %s4486_s23, %s4486_s23, %s4487_s11  }
  0x48   : > { %p3411_p5 = scmp.ge.s32.totalorder %s4483_s13, 1  ;;  %p549_p0 = scmp.lt.s32.totalorder %s4483_s13, 5 }
  0x49   : > { %s5447_s18 = sshll.u32 %s4646_s19, 8  ;;  %s3559_s9 = sshll.u32 %s4475_s29, 12 }
  0x4a   : > { %p4701_p1 = pnand %p3411_p5, %p549_p0  ;;  %s488_s10 = scalar_lea.vmem [#allocation9], %s5447_s18 }
  0x4b   : > { %s495_s12 = sshll.u32 %s488_s10, 4  ;;  %s5495_s6 = sld [smem:[#allocation39_spill]]  ;;  %s4715_s12 = int_to_ptr.vmem [resolvable:$true] %s495_s12 }
  0x4c   : > { %s5494_s17 = scalar_select %p4701_p1, 1, 0 }
  0x4d   : > { %s5496_s14 = sand.u32 1, %s4483_s13  }
  0x4e   : > { %s4719_s16 = scalar_lea.sflag [#allocation10], %s5496_s14 }
  0x51   : > { %s4713_s4 = scalar_lea.hbm %s5495_s6, %s3559_s9  ;;  %s4238_s1 = scalar_lea.hbm %s5495_s6, 8192 }
  0x52   : > { %s4233_s23 = scalar_lea.hbm %s4713_s4, 4096  ;;  %p4239_p4 = scmp.lt.u32.totalorder %s4713_s4, %s5495_s6 }
  0x53   : > { %p4234_p3 = scmp.ne.s32.totalorder %s4713_s4, %s4233_s23  ;;  %p4240_p6 = scmp.lt.u32.totalorder %s4238_s1, %s4233_s23 }
  0x54   : > { %p4242_p10 = scmp.lt.u32.totalorder %s4233_s23, %s4713_s4 }
  0x55   : > { %p4236_p11 = pnand %p4234_p3, %p4674_p9  ;;  %p4241_p8 = por %p4240_p6, %p4239_p4 }
  0x57   : > { %p4237_p2 = pneg %p4236_p11  ;;  %p4243_p12 = por %p4242_p10, %p4241_p8 }
  0x59   : > { %p4244_p13 = pnand %p4243_p12, %p4237_p2 }
  0x5b   : > { %4247 = shalt.err (!%p4244_p13)
}
  0x5c   : > { %s4248_s14 = scalar_lea.vmem %s4715_s12, 4096  ;;  %s4488_s11 = smov [#allocation9]  }
  0x5d   : > { %p4249_p5 = scmp.ne.s32.totalorder %s4715_s12, %s4248_s14  ;;  %s4253_s10 = sshll.u32 %s4488_s11, 4  ;;  %s4254_s10 = int_to_ptr.vmem [resolvable:$false] %s4253_s10 }
  0x5e   : > { %s4255_s18 = scalar_lea.vmem %s4254_s10, 8192  ;;  %p4256_p11 = scmp.lt.s32.totalorder %s4715_s12, %s4254_s10 }
  0x5f   : > { %p4251_p0 = pnand %p4249_p5, %p4674_p9  ;;  %p4257_p1 = scmp.lt.s32.totalorder %s4255_s18, %s4248_s14 }
  0x61   : > { %p4252_p3 = pneg %p4251_p0  ;;  %p4258_p4 = por %p4257_p1, %p4256_p11 }
  0x63   : > { %p4259_p6 = pnand %p4258_p4, %p4252_p3 }
  0x65   : > { %4262 = shalt.err (!%p4259_p6)
}
  0x66   : > { %s4489_s23 = smov 256   ;;  %s4490_s1 = smov 16  }
  0x67   : > { %3888 = dma.hbm_to_vmem [thread:$0]  (!%p4654_p7), %s4713_s4, 4096, %s4715_s12, %s4719_s16, %s4489_s23, %s4489_s23, %s4490_s1  }
  0x68   : > { %s5497_s8 = sld [smem:[#allocation41_spill]]  ;;  %s5498_s10 = sshll.u32 %s4646_s19, 8 }
  0x69   : > { %s516_s18 = scalar_lea.vmem [#allocation11], %s5498_s10  ;;  %s4755_s3 = sadd.s32 4294967295, %s4483_s13  }
  0x6a   : > { %s523_s6 = sshll.u32 %s516_s18, 4  ;;  %5499 = sst [smem:[#allocation28_spill]] %s4755_s3  ;;  %s4752_s6 = int_to_ptr.vmem [resolvable:$true] %s523_s6 }
  0x6b   : > { %s3394_s4 = sadd.s32 4294967294, %s4483_s13   ;;  %s46_s12 = sadd.s32 1, %s4479_s30 }
  0x6c   : > { %s53_s23 = sadd.s32 1, %s4463_s26  ;;  %p5500_p1 = scmp.ne.s32.totalorder %s5488_s15, 0 }
  0x6d   : > { %p60_p2 = scmp.ne.s32.totalorder %s4463_s26, %s4459_s25  ;;  %p66_p8 = scmp.ne.s32.totalorder %s4459_s25, %s4455_s24 }
  0x6e   : > { %s4748_s11 = scalar_lea.hbm %s5497_s8, %s3559_s9  ;;  %s5560_s12 = smov (!%p5500_p1, %s46_s12), %s4479_s30 }
  0x6f   : > { %p48_p10 = scmp.ge.s32.totalorder %s5560_s12, 2  ;;  %p67_p12 = scmp.eq.s32.totalorder %s4755_s3, 0 }
  0x70   : > { %p5501_p13 = scmp.eq.s32.totalorder %s4483_s13, 0  ;;  %p376_p0 = scmp.eq.s32.totalorder %s4755_s3, 3 }
  0x71   : > { %s5562_s12 = smov (%p48_p10, %s5560_s12), 0  ;;  %p4780_p3 = por %p67_p12, %p66_p8 }
  0x72   : > { %p4770_p5 = por %p5501_p13, %p60_p2  ;;  %5503 = sst [smem:[#allocation29_spill]] %s5562_s12 }
  0x73   : > { %s5504_s15 = scalar_select %p4780_p3, 1, 0 }
  0x74   : > { %p5506_p11 = scmp.ne.s32.totalorder %s4447_s22, %s4443_s21  ;;  %s50_s5 = ssub.s32 %s4479_s30, %s5562_s12 }
  0x75   : > { %5505 = sst [smem:[#allocation30_spill]] %s5504_s15  ;;  %p4793_p6 = por %p376_p0, %p60_p2 }
  0x76   : > { %p4787_p4 = por %p5506_p11, %p67_p12  ;;  %p51_p1 = scmp.eq.s32.totalorder %s50_s5, 0 }
  0x77   : > { %s5508_s14 = scalar_select %p4793_p6, 1, 0 }
  0x78   : > { %s5507_s1 = scalar_select %p4787_p4, 1, 0 }
  0x79   : > { %p382_p10 = scmp.eq.s32.totalorder %s3394_s4, 3  ;;  %s402_s10 = sand.u32 1, %s4463_s26  }
  0x7a   : > { %s3557_s18 = sshll.u32 %s4479_s30, 8  ;;  %s3397_s21 = sshll.u32 %s402_s10, 4 }
  0x7b   : > { %s4800_s27 = scalar_select %p51_p1, %s4463_s26, %s53_s23  }
  0x7c   : > { %p4805_p13 = por %p382_p10, %p66_p8  ;;  %s5512_s0 = sld [smem:[#allocation33_spill]] }
  0x7d   : > { %5509 = sst [smem:[#allocation31_spill]] %s4800_s27  ;;  %p5513_p2 = scmp.lt.s32.totalorder %s4483_s13, 4 }
  0x7e   : > { %s5510_s3 = scalar_select %p4805_p13, 1, 0 }
  0x7f   : > { %p4818_p12 = pnand %p5513_p2, %p4770_p5  ;;  %s406_s23 = scalar_lea.vmem [#allocation3], %s3397_s21 }
  0x80   : > { %5511 = sst [smem:[#allocation32_spill]] %s5510_s3  ;;  %s414_s5 = sshll.u32 %s406_s23, 4  ;;  %s4822_s5 = int_to_ptr.vmem [resolvable:$true] %s414_s5 }
  0x81   : > { %s3402_s30 = sshll.u32 %s4646_s19, 6  ;;  %s4825_s22 = scalar_lea.sflag [#allocation4], %s402_s10 }
  0x82   : > { %s4812_s12 = scalar_lea.hbm %s5512_s0, %s3557_s18  ;;  %p4265_p0 = pneg %p4818_p12 }
  0x83   : > { %s4263_s15 = scalar_lea.hbm %s4812_s12, 256  ;;  %s4268_s27 = scalar_lea.hbm %s5512_s0, 512 }
  0x84   : > { %p4264_p8 = scmp.ne.s32.totalorder %s4812_s12, %s4263_s15  ;;  %p4269_p1 = scmp.lt.u32.totalorder %s4812_s12, %s5512_s0 }
  0x85   : > { %p4270_p10 = scmp.lt.u32.totalorder %s4268_s27, %s4263_s15  ;;  %p4272_p13 = scmp.lt.u32.totalorder %s4263_s15, %s4812_s12 }
  0x86   : > { %p4266_p11 = pnand %p4265_p0, %p4264_p8 }
  0x87   : > { %p4271_p2 = por %p4270_p10, %p4269_p1 }
  0x88   : > { %p4267_p5 = pneg %p4266_p11 }
  0x89   : > { %p4273_p6 = por %p4272_p13, %p4271_p2 }
  0x8b   : > { %p4274_p4 = pnand %p4273_p6, %p4267_p5 }
  0x8d   : > { %4277 = shalt.err (!%p4274_p4)
}
  0x8e   : > { %s4278_s10 = scalar_lea.vmem %s4822_s5, 256  ;;  %s4491_s23 = smov [#allocation3]  }
  0x8f   : > { %p4279_p8 = scmp.ne.s32.totalorder %s4822_s5, %s4278_s10  ;;  %s4283_s9 = sshll.u32 %s4491_s23, 4  ;;  %s4284_s9 = int_to_ptr.vmem [resolvable:$false] %s4283_s9 }
  0x90   : > { %s4285_s26 = scalar_lea.vmem %s4284_s9, 512  ;;  %p4286_p7 = scmp.lt.s32.totalorder %s4822_s5, %s4284_s9 }
  0x91   : > { %p4281_p11 = pnand %p4279_p8, %p4265_p0  ;;  %p4287_p1 = scmp.lt.s32.totalorder %s4285_s26, %s4278_s10 }
  0x93   : > { %p4282_p3 = pneg %p4281_p11  ;;  %p4288_p10 = por %p4287_p1, %p4286_p7 }
  0x95   : > { %p4289_p13 = pnand %p4288_p10, %p4282_p3 }
  0x97   : > { %4292 = shalt.err (!%p4289_p13)
}
  0x98   : > { %s4492_s27 = smov 64   ;;  %s4493_s15 = smov 4  }
  0x99   : > { %3879 = dma.hbm_to_vmem [thread:$0]  (!%p4818_p12), %s4812_s12, 256, %s4822_s5, %s4825_s22, %s4492_s27, %s4492_s27, %s4493_s15  }
  0x9a   : > { %s3558_s18 = sshll.u32 %s4475_s29, 10  ;;  %s5515_s2 = sld [smem:[#allocation35_spill]] }
  0x9b   : > { %s449_s9 = scalar_lea.vmem [#allocation8], %s3402_s30 }
  0x9c   : > { %s456_s26 = sshll.u32 %s449_s9, 4  ;;  %s4864_s26 = int_to_ptr.vmem [resolvable:$true] %s456_s26 }
  0xa0   : > { %s4860_s23 = scalar_lea.hbm %s5515_s2, %s3558_s18  ;;  %s4298_s22 = scalar_lea.hbm %s5515_s2, 2048 }
  0xa1   : > { %s4293_s4 = scalar_lea.hbm %s4860_s23, 1024  ;;  %p4299_p6 = scmp.lt.u32.totalorder %s4860_s23, %s5515_s2 }
  0xa2   : > { %p4294_p7 = scmp.ne.s32.totalorder %s4860_s23, %s4293_s4  ;;  %p4300_p12 = scmp.lt.u32.totalorder %s4298_s22, %s4293_s4 }
  0xa3   : > { %p4302_p5 = scmp.lt.u32.totalorder %s4293_s4, %s4860_s23 }
  0xa4   : > { %p4296_p3 = pnand %p4294_p7, %p4674_p9  ;;  %p4301_p0 = por %p4300_p12, %p4299_p6 }
  0xa6   : > { %p4297_p4 = pneg %p4296_p3  ;;  %p4303_p2 = por %p4302_p5, %p4301_p0 }
  0xa8   : > { %p4304_p8 = pnand %p4303_p2, %p4297_p4 }
  0xaa   : > { %4307 = shalt.err (!%p4304_p8)
}
  0xab   : > { %s4308_s30 = scalar_lea.vmem %s4864_s26, 1024  ;;  %s4494_s19 = smov [#allocation8]  }
  0xac   : > { %p4309_p11 = scmp.ne.s32.totalorder %s4864_s26, %s4308_s30  ;;  %s4313_s10 = sshll.u32 %s4494_s19, 4  ;;  %s4314_s10 = int_to_ptr.vmem [resolvable:$false] %s4313_s10 }
  0xad   : > { %s4315_s9 = scalar_lea.vmem %s4314_s10, 2048  ;;  %p4316_p13 = scmp.lt.s32.totalorder %s4864_s26, %s4314_s10 }
  0xae   : > { %p4311_p1 = pnand %p4309_p11, %p4674_p9  ;;  %p4317_p7 = scmp.lt.s32.totalorder %s4315_s9, %s4308_s30 }
  0xb0   : > { %p4312_p10 = pneg %p4311_p1  ;;  %p4318_p3 = por %p4317_p7, %p4316_p13 }
  0xb2   : > { %p4319_p6 = pnand %p4318_p3, %p4312_p10 }
  0xb4   : > { %4322 = shalt.err (!%p4319_p6)
}
  0xb5   : > { %p5516_p4 = scmp.ne.s32.totalorder %s5491_s28, 0  ;;  %s4323_s4 = scalar_lea.hbm %s4748_s11, 4096 }
  0xb6   : > { %p4324_p12 = scmp.ne.s32.totalorder %s4748_s11, %s4323_s4  ;;  %s4328_s22 = scalar_lea.hbm %s5497_s8, 8192 }
  0xb7   : > { %3885 = dma.hbm_to_vmem [thread:$0]  (!%p5516_p4), %s4860_s23, 1024, %s4864_s26, %s4668_s20, %s4492_s27, %s4492_s27, %s4493_s15  }
  0xb8   : > { %p4326_p0 = pnand %p4324_p12, %p4674_p9  ;;  %p4329_p2 = scmp.lt.u32.totalorder %s4748_s11, %s5497_s8 }
  0xb9   : > { %p4330_p8 = scmp.lt.u32.totalorder %s4328_s22, %s4323_s4  ;;  %p4332_p1 = scmp.lt.u32.totalorder %s4323_s4, %s4748_s11 }
  0xba   : > { %p4327_p5 = pneg %p4326_p0 }
  0xbb   : > { %p4331_p11 = por %p4330_p8, %p4329_p2 }
  0xbd   : > { %p4333_p10 = por %p4332_p1, %p4331_p11 }
  0xbf   : > { %p4334_p13 = pnand %p4333_p10, %p4327_p5 }
  0xc1   : > { %4337 = shalt.err (!%p4334_p13)
}
  0xc2   : > { %s4338_s20 = scalar_lea.vmem %s4752_s6, 4096  ;;  %s4495_s23 = smov [#allocation11]  }
  0xc3   : > { %p4339_p7 = scmp.ne.s32.totalorder %s4752_s6, %s4338_s20  ;;  %s4343_s26 = sshll.u32 %s4495_s23, 4  ;;  %s4344_s26 = int_to_ptr.vmem [resolvable:$false] %s4343_s26 }
  0xc4   : > { %s4345_s30 = scalar_lea.vmem %s4344_s26, 8192  ;;  %p4346_p12 = scmp.lt.s32.totalorder %s4752_s6, %s4344_s26 }
  0xc5   : > { %p4341_p3 = pnand %p4339_p7, %p4674_p9  ;;  %p4347_p0 = scmp.lt.s32.totalorder %s4345_s30, %s4338_s20 }
  0xc7   : > { %p4342_p6 = pneg %p4341_p3  ;;  %p4348_p2 = por %p4347_p0, %p4346_p12 }
  0xc9   : > { %p4349_p8 = pnand %p4348_p2, %p4342_p6 }
  0xcb   : > { %4352 = shalt.err (!%p4349_p8)
}
  0xcc   : > { %3891 = dma.hbm_to_vmem [thread:$0]  (!%p5516_p4), %s4748_s11, 4096, %s4752_s6, %s4719_s16, %s4492_s27, %s4492_s27, %s4493_s15  }
  0xcd   : > { %p5517_p9 = scmp.ne.s32.totalorder %s5494_s17, 0 }
  0xce   : > { %s5518_s7 = sld [smem:[#allocation30_spill]] (!%p5517_p9)  ;;  %s4919_s19 = sand.u32 (!%p5517_p9), 1, %s4459_s25  }
  0xcf   : > { %553 = sbr.rel (%p5517_p9) target bundleno = 4429 (0x114d), region = 68  ;;  %s5461_s10 = sshll.u32 (!%p5517_p9), %s4919_s19, 4 }
  0xd0   : > { %s556_s9 = scalar_lea.sflag (!%p5517_p9), [#allocation4], %s4919_s19  ;;  %s4925_s28 = scalar_lea.vmem (!%p5517_p9), [#allocation3], %s5461_s10 }
  0xd4   : > { %p5519_p5 = scmp.ne.s32.totalorder (!%p5517_p9), %s5518_s7, 0 }
  0xd6   : > { %4426 = dma.done.wait (%p5519_p5), %s556_s9, 256  }
  0xd7   : > { %4428 = vsyncadd (%p5519_p5), %s556_s9, 4294967040  ;;  %s5520_s6 = sld [smem:[#allocation28_spill]]  ;;  %s5521_s17 = sld [smem:[#allocation17_spill]] }
  0xd8   : > { %p5522_p4 = scmp.ne.s32.totalorder %s5507_s1, 0 }
  0xdd   : > { %s564_s16 = sand.u32 1, %s5520_s6   ;;  %s566_s11 = sand.u32 1, %s5521_s17  }
  0xde   : > { %s3863_s27 = smul.u32 192, %s566_s11  ;;  %s565_s15 = scalar_lea.sflag [#allocation7], %s564_s16 }
  0xe0   : > { %s4933_s4 = scalar_lea.vmem [#allocation6], %s3863_s27 }
  0xe1   : > { %4430 = dma.done.wait (%p5522_p4), %s565_s15, 4096  }
  0xe2   : > { %4432 = vsyncadd (%p5522_p4), %s565_s15, 4294963200  ;;  %s3413_s12 = sshll.u32 %s566_s11, 6  ;;  %s3414_s5 = sshll.u32 %s566_s11, 8 }
  0xe3   : > { %s4939_s22 = scalar_lea.vmem [#allocation8], %s3413_s12  ;;  %s583_s18 = scalar_lea.sflag [#allocation10], %s564_s16 }
  0xe4   : > { %s4941_s21 = scalar_lea.vmem [#allocation9], %s3414_s5 }
  0xe5   : > { %4434 = dma.done.wait (%p5522_p4), %s583_s18, 8192  }
  0xe6   : > { %4436 = vsyncadd (%p5522_p4), %s583_s18, 4294959104  ;;  %s5523_s20 = sld [smem:[#allocation22_spill]]  ;;  %s5526_s15 = sld [smem:[#allocation38_spill]] }
  0xe7   : > { %s5527_s2 = sld [smem:[#allocation40_spill]]  ;;  %s5528_s29 = sld [smem:[#allocation42_spill]] }
  0xe8   : > { %s5529_s9 = sld [smem:[#allocation43_spill]]  ;;  %s5530_s17 = sld [smem:[#allocation44_spill]] }
  0xe9   : > { %s4981_s11 = scalar_lea.vmem [#allocation11], %s3414_s5  ;;  %s5531_s27 = sshll.u32 %s4919_s19, 4 }
  0xec   : > { %p679_p11 = scmp.lt.s32.totalorder %s5523_s20, 1  ;;  %p3418_p1 = scmp.ne.s32.totalorder %s5523_s20, 0 }
  0xed   : > { %v3568_v0 = vld [vmem:[%s4925_s28] sm:$0xff] (!%p3418_p1)   ;;  %v3585_v1 = vld [vmem:[%s4925_s28 + $0x8] sm:$0xff] (!%p3418_p1)  }
  0xee   : > { %s4949_s23 = scalar_select %p679_p11, %s5523_s20, 1 }
  0xef   : > { %706 = sbr.rel (%p3418_p1) target bundleno = 246 (0xf6), region = 92  ;;  %v3569_v2 = vunpack.c.l.bf16 (!%p3418_p1), %v3568_v0  ;;  %v3570_v3 = vunpack.c.h.bf16 (!%p3418_p1), %v3568_v0  ;;  %v3573_v4 = vunpack.c.l.bf16 (!%p3418_p1), %v3585_v1  ;;  %v3574_v5 = vunpack.c.h.bf16 (!%p3418_p1), %v3585_v1 }
  0xf0   : > { %s687_s12 = scalar_lea.vmem %s5526_s15, %s4949_s23  ;;  %s3417_s18 = sshll.u32 %s4949_s23, 2 }
  0xf1   : > { %s4967_s26 = scalar_lea.vmem %s5527_s2, %s3417_s18  ;;  %s694_s25 = scalar_lea.vmem %s5528_s29, %s4949_s23  ;;  %715 = vst [vmem:[#allocation2] sm:$0xff] (!%p3418_p1), %v3569_v2  ;;  %716 = vst [vmem:[#allocation2 + $0x8] sm:$0xff] (!%p3418_p1), %v3570_v3 }
  0xf2   : > { %s697_s24 = scalar_lea.vmem %s5529_s9, %s4949_s23  ;;  %s700_s16 = scalar_lea.vmem %s5530_s17, %s4949_s23  ;;  %717 = vst [vmem:[#allocation2 + $0x10] sm:$0xff] (!%p3418_p1), %v3573_v4  ;;  %718 = vst [vmem:[#allocation2 + $0x18] sm:$0xff] (!%p3418_p1), %v3574_v5 }
  0xf3   : > { %s4985_s15 = scalar_lea.vmem [#allocation12], %s5531_s27 }
  0xf6 PF: > { %v3999_v6 = vld [vmem:[%s4933_s4 + $0x4] ss:$12 sps:$4 sm:$0xff]   ;;  %v4001_v7 = vld [vmem:[%s4933_s4] ss:$12 sps:$4 sm:$0xff]   ;;  %v4496_v8 = vmov 0   ;;  %v4497_v37 = vmov 0.0  }
  0xf7   : > { %917 = vmatprep.mubr.bf16.mxu0 %v4496_v8  ;;  %885 = vmatprep.subr.bf16.mxu0 %v3999_v6  ;;  %v4002_v9 = vld [vmem:[%s4933_s4 + $0x1c] ss:$12 sps:$4 sm:$0xff]   ;;  %v4004_v10 = vld [vmem:[%s4933_s4 + $0x18] ss:$12 sps:$4 sm:$0xff]   ;;  %v4005_v11 = vld [vmem:[%s4933_s4 + $0x34] ss:$12 sps:$4 sm:$0xff]  }
  0xf8   : > { %886 = vmatpush1.bf16.msra.mxu0 %v4001_v7  ;;  %v4007_v12 = vld [vmem:[%s4933_s4 + $0x30] ss:$12 sps:$4 sm:$0xff]   ;;  %v4008_v13 = vld [vmem:[%s4933_s4 + $0x4c] ss:$12 sps:$4 sm:$0xff]   ;;  %v719_v14 = vld [vmem:[#allocation2] sm:$0xff]  ;;  %vm4498_vm0 = vmmov 0  }
  0xf9   : > { %887 = vmatprep.subr.bf16.mxu0 %v4002_v9  ;;  %v4010_v15 = vld [vmem:[%s4933_s4 + $0x48] ss:$12 sps:$4 sm:$0xff]   ;;  %v4011_v16 = vld [vmem:[%s4933_s4 + $0x64] ss:$12 sps:$4 sm:$0xff]   ;;  %v4024_v20 = vld [vmem:[%s4933_s4 + $0x20] ss:$12 sps:$4 sm:$0xff]  }
  0xfa   : > { %v720_v17 = vld [vmem:[#allocation2 + $0x8] sm:$0xff]  ;;  %v4025_v23 = vld [vmem:[%s4933_s4 + $0x38] ss:$12 sps:$4 sm:$0xff]   ;;  %v4017_v25 = vld [vmem:[%s4933_s4 + $0x94] ss:$12 sps:$4 sm:$0xff]   ;;  %vm993_vm1 = vcmask 261120  }
  0xfb   : > { %v723_v18 = vpack.c.bf16 %v720_v17, %v719_v14  ;;  %v4023_v19 = vld [vmem:[%s4933_s4 + $0x8] ss:$12 sps:$4 sm:$0xff]   ;;  %v4013_v21 = vld [vmem:[%s4933_s4 + $0x60] ss:$12 sps:$4 sm:$0xff]   ;;  %v4016_v24 = vld [vmem:[%s4933_s4 + $0x78] ss:$12 sps:$4 sm:$0xff]  }
  0xfc   : > { %888 = vmatpush1.bf16.msra.mxu0 %v4004_v10  ;;  %3701 = vmatprep.subr.bf16.mxu1 %v4023_v19  ;;  %v4014_v22 = vld [vmem:[%s4933_s4 + $0x7c] ss:$12 sps:$4 sm:$0xff]   ;;  %v4020_v28 = vld [vmem:[%s4933_s4 + $0xac] ss:$12 sps:$4 sm:$0xff]   ;;  %v721_v33 = vld [vmem:[#allocation2 + $0x10] sm:$0xff]  ;;  %vm1088_vm2 = vcmask 130048  }
  0xfd   : > { %889 = vmatprep.subr.bf16.mxu0 %v4005_v11  ;;  %3717 = vmatprep.mubr.bf16.mxu1 %v723_v18  ;;  %v4026_v26 = vld [vmem:[%s4933_s4 + $0x50] ss:$12 sps:$4 sm:$0xff]   ;;  %v4027_v29 = vld [vmem:[%s4933_s4 + $0x68] ss:$12 sps:$4 sm:$0xff]   ;;  %v4028_v31 = vld [vmem:[%s4933_s4 + $0x80] ss:$12 sps:$4 sm:$0xff]  }
  0xfe   : > { %3702 = vmatpush3.bf16.msra.mxu1 %v4023_v19  ;;  %v4019_v27 = vld [vmem:[%s4933_s4 + $0x90] ss:$12 sps:$4 sm:$0xff]   ;;  %v4022_v30 = vld [vmem:[%s4933_s4 + $0xa8] ss:$12 sps:$4 sm:$0xff]   ;;  %v4029_v32 = vld [vmem:[%s4933_s4 + $0x98] ss:$12 sps:$4 sm:$0xff]  }
  0xff   : > { %3703 = vmatprep.subr.bf16.mxu1 %v4024_v20  ;;  %v722_v34 = vld [vmem:[#allocation2 + $0x18] sm:$0xff]  ;;  %s4499_s0 = smov 96   ;;  %s4500_s2 = smov 64  }
 0x100   : > { %890 = vmatpush1.bf16.msra.mxu0 %v4007_v12  ;;  %v4030_v35 = vld [vmem:[%s4933_s4 + $0xb0] ss:$12 sps:$4 sm:$0xff]   ;;  %v724_v36 = vpack.c.bf16 %v722_v34, %v721_v33  ;;  %s4501_s3 = smov 32   ;;  %s5532_s10 = sld [smem:[#allocation36_spill]] }
 0x101   : > { %891 = vmatprep.subr.bf16.mxu0 %v4008_v13 }
 0x102   : > { %3704 = vmatpush3.bf16.msra.mxu1 %v4024_v20 }
 0x103   : > { %3705 = vmatprep.subr.bf16.mxu1 %v4025_v23 }
 0x104   : > { %892 = vmatpush1.bf16.msra.mxu0 %v4010_v15 }
 0x105   : > { %893 = vmatprep.subr.bf16.mxu0 %v4011_v16 }
 0x106   : > { %3706 = vmatpush3.bf16.msra.mxu1 %v4025_v23  ;;  %s5533_s28 = scalar_lea.vmem %s5532_s10, %s4949_s23 }
 0x107   : > { %3707 = vmatprep.subr.bf16.mxu1 %v4026_v26 }
 0x108   : > { %894 = vmatpush1.bf16.msra.mxu0 %v4013_v21 }
 0x109   : > { %895 = vmatprep.subr.bf16.mxu0 %v4014_v22 }
 0x10a   : > { %3708 = vmatpush3.bf16.msra.mxu1 %v4026_v26 }
 0x10b   : > { %3709 = vmatprep.subr.bf16.mxu1 %v4027_v29 }
 0x10c   : > { %896 = vmatpush1.bf16.msra.mxu0 %v4016_v24 }
 0x10d   : > { %897 = vmatprep.subr.bf16.mxu0 %v4017_v25 }
 0x10e   : > { %3710 = vmatpush3.bf16.msra.mxu1 %v4027_v29 }
 0x10f   : > { %3711 = vmatprep.subr.bf16.mxu1 %v4028_v31 }
 0x110   : > { %898 = vmatpush1.bf16.msra.mxu0 %v4019_v27 }
 0x111   : > { %899 = vmatprep.subr.bf16.mxu0 %v4020_v28 }
 0x112   : > { %3712 = vmatpush3.bf16.msra.mxu1 %v4028_v31 }
 0x113   : > { %3713 = vmatprep.subr.bf16.mxu1 %v4029_v32 }
 0x114   : > { %900 = vmatpush1.bf16.msra.mxu0 %v4022_v30 }
 0x115   : > { %3727 = vmatprep.subr.bf16.mxu0 %v4497_v37 }
 0x116   : > { %3714 = vmatpush3.bf16.msra.mxu1 %v4029_v32 }
 0x117   : > { %918 = vmatmul.mubr.bf16.vlgmr.msra.gmra.mrb[0].mxu0 %v723_v18  ;;  %3715 = vmatprep.subr.bf16.mxu1 %v4030_v35 }
 0x118   : > { %927 = vmatprep.mubr.bf16.mxu0 %v4496_v8 }
 0x11a   : > { %3716 = vmatpush3.bf16.msra.mxu1 %v4030_v35 }
 0x11b   : > { %3721 = vmatprep.subr.bf16.mxu1 %v4497_v37 }
 0x11d   : > { %3718 = vmatmul.mubr.bf16.vlgmr.msra.gmra.mrb[0].mxu1 %v724_v36 }
 0x11e   : > { %3723 = vmatprep.mubr.msk.bf16.mxu1 %vm4498_vm0, %v4497_v37 }
 0x11f   : > { %928 = vmatmul.mubr.bf16.gmra.mrb[4].mxu0 %v724_v36 }
 0x120   : > { %3729 = vmatprep.mubr.msk.bf16.mxu0 %vm4498_vm0, %v4497_v37 }
 0x1ea   : > { %v919_v38 = vpop.f32.mrb[0].mxu0 }
 0x1eb   : > { %v921_v39 = vpop.f32.mrb[1].mxu0 }
 0x1ec   : > { %v923_v40 = vpop.f32.mrb[2].mxu0 }
 0x1ed   : > { %v5022_v41 = vpack.c.bf16 %v923_v40, %v919_v38  ;;  %v925_v42 = vpop.f32.mrb[3].mxu0 }
 0x1ee   : > { %v5024_v43 = vpack.c.bf16 %v925_v42, %v921_v39 }
 0x1f0   : > { %v998_v44 = vsel %vm993_vm1, %v5024_v43, 0  ;;  %v3719_v51 = vpop.f32.mrb[0].mxu1 }
 0x1f1   : > { %3722 = vmatpush3.bf16.xpose.msra.mxu1 %v998_v44  ;;  %v972_v52 = vpop.f32.mrb[1].mxu1 }
 0x1f2   : > { %v929_v45 = vpop.f32.mrb[4].mxu0  ;;  %3733 = vmatprep.subr.bf16.mxu1 %v4497_v37  ;;  %v3720_v54 = vpop.f32.mrb[2].mxu1 }
 0x1f3   : > { %v931_v46 = vpop.f32.mrb[5].mxu0  ;;  %v5037_v55 = vpack.c.bf16 %v3720_v54, %v3719_v51  ;;  %v975_v56 = vpop.f32.mrb[3].mxu1 }
 0x1f4   : > { %v933_v47 = vpop.f32.mrb[6].mxu0  ;;  %v5041_v57 = vpack.c.bf16 %v975_v56, %v972_v52 }
 0x1f5   : > { %v5029_v48 = vpack.c.bf16 %v933_v47, %v929_v45  ;;  %v935_v49 = vpop.f32.mrb[7].mxu0 }
 0x1f6   : > { %v5031_v50 = vpack.c.bf16 %v935_v49, %v931_v46 }
 0x1f8   : > { %3724 = vmatmul.mubr.msk.bf16.vlgmr.msra.gmra.mrb[4].mxu1 %vm993_vm1, %v5022_v41  ;;  %v1045_v53 = vsel %vm993_vm1, %v5031_v50, 0 }
 0x1f9   : > { %3728 = vmatpush3.bf16.xpose.msra.mxu0 %v1045_v53  ;;  %3735 = vmatprep.mubr.msk.bf16.mxu1 %vm4498_vm0, %v4497_v37 }
 0x1fa   : > { %3739 = vmatprep.subr.bf16.mxu0 %v4497_v37  ;;  %3734 = vmatpush3.bf16.msra.mxu1 %v5041_v57 }
 0x1fb   : > { %3745 = vmatprep.subr.bf16.mxu1 %v4497_v37 }
 0x200   : > { %3730 = vmatmul.mubr.msk.bf16.vlgmr.msra.gmra.mrb[8].mxu0 %vm993_vm1, %v5029_v48 }
 0x201   : > { %3740 = vmatpush3.bf16.msra.mxu0 %v5037_v55  ;;  %3741 = vmatprep.mubr.msk.bf16.mxu0 %vm4498_vm0, %v4497_v37 }
 0x202   : > { %3751 = vmatprep.subr.bf16.mxu0 %v4497_v37 }
 0x2cb   : > { %v1034_v58 = vpop.f32.mrb[4].mxu1 }
 0x2cc   : > { %v3725_v59 = vpop.f32.mrb[5].mxu1  ;;  %v1089_v20 = vsel %vm1088_vm2, %v1034_v58, -inf }
 0x2cd   : > { %v1037_v60 = vpop.f32.mrb[6].mxu1 }
 0x2ce   : > { %v3726_v61 = vpop.f32.mrb[7].mxu1  ;;  %v1092_v4 = vsel %vm1088_vm2, %v1037_v60, -inf }
 0x2d3   : > { %v1081_v62 = vpop.f32.mrb[8].mxu0 }
 0x2d4   : > { %v3731_v63 = vpop.f32.mrb[9].mxu0  ;;  %v1095_v0 = vsel %vm1088_vm2, %v1081_v62, -inf }
 0x2d5   : > { %1096 = vmax.xlane.f32.xlu0 %v1095_v0  ;;  %v1084_v1 = vpop.f32.mrb[10].mxu0 }
 0x2d6   : > { %v3732_v2 = vpop.f32.mrb[11].mxu0  ;;  %v1098_v3 = vsel %vm1088_vm2, %v1084_v1, -inf }
 0x2d9   : > { %1099 = vmax.xlane.f32.xlu0 %v1098_v3 }
 0x2ef   : > { %1286 = vrot.lane.b32.xlu0 %v5031_v50, %s4499_s0 }
 0x30e   : > { %1093 = vmax.xlane.f32.xlu0 %v1092_v4 }
 0x362   : > { %v1097_v5 = vpop.xlane.xlu0 %1096 }
 0x363   : > { %v1103_v6 = vsub.f32 %v1081_v62, %v1097_v5 }
 0x365   : > { %v1109_v7 = vmul.f32 1.442695, %v1103_v6 }
 0x366   : > { %v1100_v9 = vpop.xlane.xlu0 %1099 }
 0x367   : > { %4119 = vpow2.f32 %v1109_v7  ;;  %v1104_v10 = vsub.f32 %v1084_v1, %v1100_v9 }
 0x369   : > { %v1111_v11 = vmul.f32 1.442695, %v1104_v10 }
 0x36a   : > { %v1287_v16 = vpop.permute.xlu0 %1286 }
 0x36b   : > { %4121 = vpow2.f32 %v1111_v11  ;;  %v1292_v30 = vsel %vm993_vm1, %v1287_v16, 0 }
 0x371   : > { %v4120_v12 = vpop.eup %4119 }
 0x372   : > { %v1119_v13 = vsel %vm1088_vm2, %v4120_v12, 0.0 }
 0x373   : > { %1120 = vadd.xlane.f32.xlu1 %v1119_v13 }
 0x375   : > { %v4122_v14 = vpop.eup %4121 }
 0x376   : > { %v1122_v15 = vsel %vm1088_vm2, %v4122_v14, 0.0 }
 0x377   : > { %1123 = vadd.xlane.f32.xlu1 %v1122_v15 }
 0x388   : > { %1283 = vrot.lane.b32.xlu1 %v5029_v48, %s4499_s0 }
 0x39b   : > { %v1094_v17 = vpop.xlane.xlu0 %1093 }
 0x39c   : > { %v1102_v18 = vsub.f32 %v1037_v60, %v1094_v17 }
 0x39e   : > { %v1107_v19 = vmul.f32 1.442695, %v1102_v18 }
 0x3a0   : > { %4123 = vpow2.f32 %v1107_v19 }
 0x3aa   : > { %v4124_v21 = vpop.eup %4123 }
 0x3ab   : > { %v1116_v22 = vsel %vm1088_vm2, %v4124_v21, 0.0 }
 0x3ac   : > { %1090 = vmax.xlane.f32.xlu1 %v1089_v20 }
 0x3b0   : > { %1117 = vadd.xlane.f32.xlu1 %v1116_v22 }
 0x3c1   : > { %1230 = vrot.lane.b32.xlu1 %v5022_v41, %s4499_s0 }
 0x400   : > { %v1121_v23 = vpop.xlane.xlu1 %1120 }
 0x401   : > { %4125 = vrcp.f32 %v1121_v23 }
 0x404   : > { %v1124_v24 = vpop.xlane.xlu1 %1123 }
 0x405   : > { %4127 = vrcp.f32 %v1124_v24 }
 0x408   : > { %v1284_v31 = vpop.permute.xlu1 %1283 }
 0x40b   : > { %v4126_v25 = vpop.eup %4125 }
 0x40c   : > { %v1131_v27 = vmul.f32 %v4126_v25, %v4120_v12 }
 0x40f   : > { %v4128_v26 = vpop.eup %4127 }
 0x410   : > { %v1132_v28 = vmul.f32 %v4128_v26, %v4122_v14 }
 0x412   : > { %v1134_v29 = vpack.c.bf16 %v1132_v28, %v1131_v27 }
 0x414   : > { %3742 = vmatmul.mubr.msk.bf16.vlgmr.msra.gmra.mrb[12].mxu0 %vm1088_vm2, %v1134_v29 }
 0x415   : > { %3752 = vmatpush3.bf16.xpose.msra.mxu0 %v1292_v30  ;;  %3753 = vmatprep.mubr.msk.bf16.mxu0 %vm4498_vm0, %v4497_v37 }
 0x416   : > { %3763 = vmatprep.subr.bf16.mxu0 %v4497_v37 }
 0x41c   : > { %3754 = vmatmul.mubr.msk.bf16.vlgmr.msra.gmra.mrb[16].mxu0 %vm993_vm1, %v1284_v31 }
 0x41d   : > { %3765 = vmatprep.mubr.msk.bf16.mxu0 %vm4498_vm0, %v4497_v37 }
 0x439   : > { %v1091_v32 = vpop.xlane.xlu1 %1090 }
 0x43a   : > { %v1101_v33 = vsub.f32 %v1034_v58, %v1091_v32 }
 0x43c   : > { %v1105_v34 = vmul.f32 1.442695, %v1101_v33 }
 0x43d   : > { %v1118_v38 = vpop.xlane.xlu1 %1117 }
 0x43e   : > { %4129 = vpow2.f32 %v1105_v34 }
 0x43f   : > { %4131 = vrcp.f32 %v1118_v38 }
 0x441   : > { %v1231_v58 = vpop.permute.xlu1 %1230 }
 0x448   : > { %v4130_v35 = vpop.eup %4129 }
 0x449   : > { %v1113_v36 = vsel %vm1088_vm2, %v4130_v35, 0.0  ;;  %v4132_v40 = vpop.eup %4131 }
 0x44a   : > { %1114 = vadd.xlane.f32.xlu0 %v1113_v36  ;;  %v1130_v44 = vmul.f32 %v4132_v40, %v4124_v21 }
 0x460   : > { %1233 = vrot.lane.b32.xlu0 %v5024_v43, %s4499_s0 }
 0x4d7   : > { %v1115_v39 = vpop.xlane.xlu0 %1114 }
 0x4d8   : > { %4133 = vrcp.f32 %v1115_v39 }
 0x4db   : > { %v1234_v46 = vpop.permute.xlu0 %1233 }
 0x4dc   : > { %v1239_v49 = vsel %vm993_vm1, %v1234_v46, 0 }
 0x4e2   : > { %v4134_v42 = vpop.eup %4133 }
 0x4e3   : > { %v1129_v45 = vmul.f32 %v4134_v42, %v4130_v35 }
 0x4e5   : > { %v1133_v47 = vpack.c.bf16 %v1130_v44, %v1129_v45 }
 0x4e7   : > { %3736 = vmatmul.mubr.msk.bf16.vlgmr.msra.gmra.mrb[8].mxu1 %vm1088_vm2, %v1133_v47  ;;  %v5078_v51 = vpop.f32.mrb[12].mxu0 }
 0x4e8   : > { %3746 = vmatpush3.bf16.xpose.msra.mxu1 %v1239_v49  ;;  %v3743_v52 = vpop.f32.mrb[13].mxu0  ;;  %3747 = vmatprep.mubr.msk.bf16.mxu1 %vm4498_vm0, %v4497_v37 }
 0x4e9   : > { %v5082_v53 = vpop.f32.mrb[14].mxu0  ;;  %3757 = vmatprep.subr.bf16.mxu1 %v4497_v37 }
 0x4ea   : > { %v1224_v54 = vpack.c.bf16 %v5082_v53, %v5078_v51  ;;  %v3744_v56 = vpop.f32.mrb[15].mxu0 }
 0x4ef   : > { %3748 = vmatmul.mubr.msk.bf16.vlgmr.msra.gmra.mrb[12].mxu1 %vm993_vm1, %v1231_v58  ;;  %v1328_v59 = vpop.f32.mrb[16].mxu0 }
 0x4f0   : > { %v3755_v60 = vpop.f32.mrb[17].mxu0  ;;  %v1341_v61 = vsel %vm1088_vm2, %v1328_v59, -inf  ;;  %3759 = vmatprep.mubr.msk.bf16.mxu1 %vm4498_vm0, %v4497_v37 }
 0x4f1   : > { %1342 = vmax.xlane.f32.xlu1 %v1341_v61  ;;  %v1331_v62 = vpop.f32.mrb[18].mxu0 }
 0x4f2   : > { %v3756_v63 = vpop.f32.mrb[19].mxu0  ;;  %v1344_v0 = vsel %vm1088_vm2, %v1331_v62, -inf }
 0x4f3   : > { %1345 = vmax.xlane.f32.xlu0 %v1344_v0 }
 0x502   : > { %1619 = vrot.lane.b32.xlu1 %v5024_v43, %s4500_s2 }
 0x57e   : > { %v1343_v1 = vpop.xlane.xlu1 %1342 }
 0x57f   : > { %v1349_v2 = vsub.f32 %v1328_v59, %v1343_v1 }
 0x580   : > { %v1346_v3 = vpop.xlane.xlu0 %1345 }
 0x581   : > { %v1355_v4 = vmul.f32 1.442695, %v1349_v2  ;;  %v1350_v5 = vsub.f32 %v1331_v62, %v1346_v3 }
 0x582   : > { %v1620_v23 = vpop.permute.xlu1 %1619 }
 0x583   : > { %4135 = vpow2.f32 %v1355_v4  ;;  %v1357_v6 = vmul.f32 1.442695, %v1350_v5  ;;  %v1625_v33 = vsel %vm993_vm1, %v1620_v23, 0  ;;  %v4032_v23 = vld [vmem:[%s4939_s22 + $0x18] sm:$0xff]  }
 0x585   : > { %4137 = vpow2.f32 %v1357_v6 }
 0x58d   : > { %v4136_v7 = vpop.eup %4135 }
 0x58e   : > { %v1365_v9 = vsel %vm1088_vm2, %v4136_v7, 0.0 }
 0x58f   : > { %v4138_v10 = vpop.eup %4137  ;;  %1366 = vadd.xlane.f32.xlu0 %v1365_v9 }
 0x590   : > { %v1368_v11 = vsel %vm1088_vm2, %v4138_v10, 0.0 }
 0x591   : > { %1369 = vadd.xlane.f32.xlu1 %v1368_v11 }
 0x5a2   : > { %1617 = vrot.lane.b32.xlu1 %v5022_v41, %s4500_s2 }
 0x5a5   : > { %1430 = vrot.lane.b32.xlu0 %v5037_v55, %s4499_s0 }
 0x5a6   : > { %1670 = vrot.lane.b32.xlu1 %v5031_v50, %s4500_s2 }
 0x5a9   : > { %1668 = vrot.lane.b32.xlu0 %v5029_v48, %s4500_s2 }
 0x5ba   : > { %v5104_v12 = vpop.f32.mrb[8].mxu1 }
 0x5bb   : > { %v3737_v13 = vpop.f32.mrb[9].mxu1 }
 0x5bc   : > { %v5106_v14 = vpop.f32.mrb[10].mxu1 }
 0x5bd   : > { %v1223_v15 = vpack.c.bf16 %v5106_v14, %v5104_v12  ;;  %v3738_v16 = vpop.f32.mrb[11].mxu1 }
 0x5c2   : > { %v1275_v17 = vpop.f32.mrb[12].mxu1 }
 0x5c3   : > { %v3749_v18 = vpop.f32.mrb[13].mxu1  ;;  %v1335_v22 = vsel %vm1088_vm2, %v1275_v17, -inf }
 0x5c4   : > { %v1278_v19 = vpop.f32.mrb[14].mxu1 }
 0x5c5   : > { %v3750_v20 = vpop.f32.mrb[15].mxu1  ;;  %v1338_v21 = vsel %vm1088_vm2, %v1278_v19, -inf }
 0x5c8   : > { %1339 = vmax.xlane.f32.xlu0 %v1338_v21 }
 0x5ca   : > { %1336 = vmax.xlane.f32.xlu1 %v1335_v22  ;;  %v4031_v22 = vld [vmem:[%s4939_s22 + $0x10] sm:$0xff]  }
 0x5db   : > { %1382 = vrot.lane.b32.xlu1 %v5041_v57, %s4499_s0 }
 0x61c   : > { %v1367_v24 = vpop.xlane.xlu0 %1366 }
 0x61d   : > { %4139 = vrcp.f32 %v1367_v24  ;;  %v4033_v24 = vld [vmem:[%s4939_s22] sm:$0xff]  }
 0x61e   : > { %v1370_v25 = vpop.xlane.xlu1 %1369 }
 0x61f   : > { %4141 = vrcp.f32 %v1370_v25 }
 0x620   : > { %v1431_v26 = vpop.permute.xlu0 %1430 }
 0x621   : > { %3764 = vmatpush3.bf16.msra.mxu0 %v1431_v26 }
 0x622   : > { %3785 = vmatprep.subr.bf16.mxu0 %v4497_v37  ;;  %v1618_v32 = vpop.permute.xlu1 %1617 }
 0x624   : > { %v1669_v36 = vpop.permute.xlu0 %1668 }
 0x626   : > { %v1671_v34 = vpop.permute.xlu1 %1670 }
 0x627   : > { %v4140_v27 = vpop.eup %4139  ;;  %v1676_v35 = vsel %vm993_vm1, %v1671_v34, 0 }
 0x628   : > { %v1377_v29 = vmul.f32 %v4140_v27, %v4136_v7 }
 0x629   : > { %v4142_v28 = vpop.eup %4141 }
 0x62a   : > { %v1378_v30 = vmul.f32 %v4142_v28, %v4138_v10 }
 0x62c   : > { %v1380_v31 = vpack.c.bf16 %v1378_v30, %v1377_v29 }
 0x62e   : > { %3766 = vmatmul.mubr.msk.bf16.vlgmr.msra.gmra.mrb[20].mxu0 %vm1088_vm2, %v1380_v31 }
 0x62f   : > { %3786 = vmatpush3.bf16.xpose.msra.mxu0 %v1625_v33  ;;  %3787 = vmatprep.mubr.msk.bf16.mxu0 %vm4498_vm0, %v4497_v37 }
 0x630   : > { %3791 = vmatprep.subr.bf16.mxu0 %v4497_v37 }
 0x636   : > { %3788 = vmatmul.mubr.msk.bf16.vlgmr.msra.gmra.mrb[24].mxu0 %vm993_vm1, %v1618_v32 }
 0x637   : > { %3792 = vmatpush3.bf16.xpose.msra.mxu0 %v1676_v35  ;;  %3793 = vmatprep.mubr.msk.bf16.mxu0 %vm4498_vm0, %v4497_v37 }
 0x638   : > { %3803 = vmatprep.subr.bf16.mxu0 %v4497_v37 }
 0x63e   : > { %3794 = vmatmul.mubr.msk.bf16.vlgmr.msra.gmra.mrb[28].mxu0 %vm993_vm1, %v1669_v36 }
 0x63f   : > { %3805 = vmatprep.mubr.msk.bf16.mxu0 %vm4498_vm0, %v4497_v37 }
 0x655   : > { %v1340_v38 = vpop.xlane.xlu0 %1339 }
 0x656   : > { %v1348_v39 = vsub.f32 %v1278_v19, %v1340_v38 }
 0x657   : > { %v1337_v40 = vpop.xlane.xlu1 %1336 }
 0x658   : > { %v1347_v42 = vsub.f32 %v1275_v17, %v1337_v40  ;;  %v1353_v44 = vmul.f32 1.442695, %v1348_v39 }
 0x65a   : > { %v1351_v45 = vmul.f32 1.442695, %v1347_v42 }
 0x65b   : > { %v1383_v46 = vpop.permute.xlu1 %1382 }
 0x65c   : > { %4143 = vpow2.f32 %v1351_v45  ;;  %3758 = vmatpush3.bf16.msra.mxu1 %v1383_v46 }
 0x65d   : > { %4145 = vpow2.f32 %v1353_v44  ;;  %3769 = vmatprep.subr.bf16.mxu1 %v4031_v22 }
 0x666   : > { %v4144_v47 = vpop.eup %4143 }
 0x667   : > { %v1359_v49 = vsel %vm1088_vm2, %v4144_v47, 0.0  ;;  %v4146_v52 = vpop.eup %4145 }
 0x668   : > { %1360 = vadd.xlane.f32.xlu0 %v1359_v49  ;;  %v1362_v56 = vsel %vm1088_vm2, %v4146_v52, 0.0 }
 0x66c   : > { %1363 = vadd.xlane.f32.xlu0 %v1362_v56 }
 0x6f5   : > { %v1361_v58 = vpop.xlane.xlu0 %1360 }
 0x6f6   : > { %4147 = vrcp.f32 %v1361_v58 }
 0x6f9   : > { %v1364_v59 = vpop.xlane.xlu0 %1363 }
 0x6fa   : > { %4149 = vrcp.f32 %v1364_v59 }
 0x700   : > { %v4148_v61 = vpop.eup %4147 }
 0x701   : > { %v5130_v60 = vpop.f32.mrb[20].mxu0  ;;  %v1375_v3 = vmul.f32 %v4148_v61, %v4144_v47  ;;  %v4034_v61 = vld [vmem:[%s4939_s22 + $0x8] sm:$0xff]  }
 0x702   : > { %v3767_v62 = vpop.f32.mrb[21].mxu0 }
 0x703   : > { %v5132_v63 = vpop.f32.mrb[22].mxu0 }
 0x704   : > { %v4150_v0 = vpop.eup %4149  ;;  %v1478_v1 = vpack.c.bf16 %v5132_v63, %v5130_v60  ;;  %v3768_v2 = vpop.f32.mrb[23].mxu0 }
 0x705   : > { %v1376_v4 = vmul.f32 %v4150_v0, %v4146_v52 }
 0x707   : > { %v1379_v5 = vpack.c.bf16 %v1376_v4, %v1375_v3 }
 0x709   : > { %3760 = vmatmul.mubr.msk.bf16.vlgmr.msra.gmra.mrb[16].mxu1 %vm1088_vm2, %v1379_v5  ;;  %v1661_v6 = vpop.f32.mrb[24].mxu0 }
 0x70a   : > { %v3789_v7 = vpop.f32.mrb[25].mxu0  ;;  %v1719_v9 = vsel %vm1088_vm2, %v1661_v6, -inf  ;;  %3770 = vmatpush3.bf16.msra.mxu1 %v4031_v22 }
 0x70b   : > { %1720 = vmax.xlane.f32.xlu0 %v1719_v9  ;;  %v1664_v10 = vpop.f32.mrb[26].mxu0  ;;  %3771 = vmatprep.subr.bf16.mxu1 %v4032_v23  ;;  %v4036_v9 = vld [vmem:[%s4939_s22 + $0x28] sm:$0xff]  }
 0x70c   : > { %v3790_v11 = vpop.f32.mrb[27].mxu0  ;;  %v1722_v13 = vsel %vm1088_vm2, %v1664_v10, -inf }
 0x70e   : > { %3772 = vmatpush3.bf16.msra.mxu1 %v4032_v23 }
 0x70f   : > { %1723 = vmax.xlane.f32.xlu0 %v1722_v13  ;;  %3777 = vmatprep.subr.bf16.mxu1 %v4033_v24 }
 0x711   : > { %v1712_v16 = vpop.f32.mrb[28].mxu0 }
 0x712   : > { %v3795_v17 = vpop.f32.mrb[29].mxu0  ;;  %v1725_v18 = vsel %vm1088_vm2, %v1712_v16, -inf }
 0x713   : > { %1726 = vmax.xlane.f32.xlu0 %v1725_v18  ;;  %v1715_v19 = vpop.f32.mrb[30].mxu0 }
 0x714   : > { %v3796_v20 = vpop.f32.mrb[31].mxu0  ;;  %v1728_v21 = vsel %vm1088_vm2, %v1715_v19, -inf }
 0x717   : > { %1729 = vmax.xlane.f32.xlu0 %v1728_v21 }
 0x798   : > { %v1721_v25 = vpop.xlane.xlu0 %1720 }
 0x799   : > { %v1731_v26 = vsub.f32 %v1661_v6, %v1721_v25 }
 0x79b   : > { %v1735_v27 = vmul.f32 1.442695, %v1731_v26 }
 0x79c   : > { %v1724_v28 = vpop.xlane.xlu0 %1723 }
 0x79d   : > { %4151 = vpow2.f32 %v1735_v27  ;;  %v1732_v29 = vsub.f32 %v1664_v10, %v1724_v28 }
 0x79f   : > { %v1737_v30 = vmul.f32 1.442695, %v1732_v29 }
 0x7a0   : > { %v1727_v31 = vpop.xlane.xlu0 %1726 }
 0x7a1   : > { %4153 = vpow2.f32 %v1737_v30  ;;  %v1733_v32 = vsub.f32 %v1712_v16, %v1727_v31 }
 0x7a3   : > { %v1739_v33 = vmul.f32 1.442695, %v1733_v32 }
 0x7a4   : > { %v1730_v34 = vpop.xlane.xlu0 %1729 }
 0x7a5   : > { %4155 = vpow2.f32 %v1739_v33  ;;  %v1734_v35 = vsub.f32 %v1715_v19, %v1730_v34 }
 0x7a7   : > { %v4152_v36 = vpop.eup %4151  ;;  %v1741_v38 = vmul.f32 1.442695, %v1734_v35 }
 0x7a8   : > { %v1743_v39 = vsel %vm1088_vm2, %v4152_v36, 0.0 }
 0x7a9   : > { %4157 = vpow2.f32 %v1741_v38  ;;  %1744 = vadd.xlane.f32.xlu1 %v1743_v39 }
 0x7ab   : > { %v4154_v40 = vpop.eup %4153 }
 0x7ac   : > { %v1746_v42 = vsel %vm1088_vm2, %v4154_v40, 0.0 }
 0x7ad   : > { %1747 = vadd.xlane.f32.xlu0 %v1746_v42 }
 0x7af   : > { %v4156_v44 = vpop.eup %4155 }
 0x7b0   : > { %v1749_v45 = vsel %vm1088_vm2, %v4156_v44, 0.0 }
 0x7b1   : > { %1750 = vadd.xlane.f32.xlu0 %v1749_v45 }
 0x7b3   : > { %v4158_v46 = vpop.eup %4157 }
 0x7b4   : > { %v1752_v47 = vsel %vm1088_vm2, %v4158_v46, 0.0 }
 0x7b5   : > { %1753 = vadd.xlane.f32.xlu0 %v1752_v47 }
 0x7ba   : > { %1812 = vrot.lane.b32.xlu1 %v5037_v55, %s4500_s2 }
 0x7cb   : > { %1765 = vrot.lane.b32.xlu0 %v5041_v57, %s4500_s2 }
 0x7cf   : > { %1938 = vrot.lane.b32.xlu0 %v5024_v43, %s4501_s3 }
 0x7d3   : > { %1989 = vrot.lane.b32.xlu0 %v5031_v50, %s4501_s3 }
 0x7d7   : > { %1936 = vrot.lane.b32.xlu0 %v5022_v41, %s4501_s3 }
 0x7db   : > { %1987 = vrot.lane.b32.xlu0 %v5029_v48, %s4501_s3 }
 0x7dc   : > { %v1422_v49 = vpop.f32.mrb[16].mxu1 }
 0x7dd   : > { %v3761_v52 = vpop.f32.mrb[17].mxu1 }
 0x7de   : > { %v1425_v56 = vpop.f32.mrb[18].mxu1 }
 0x7df   : > { %v1477_v58 = vpack.c.bf16 %v1425_v56, %v1422_v49  ;;  %v3762_v59 = vpop.f32.mrb[19].mxu1 }
 0x7e1   : > { %3773 = vmatprep.mubr.msk.bf16.mxu1 %vm993_vm1, %v1477_v58 }
 0x7e2   : > { %3774 = vmatmul.mubr.msk.bf16.vlgmr.msra.gmra.mrb[20].mxu1 %vm993_vm1, %v1478_v1 }
 0x7e3   : > { %3781 = vmatprep.mubr.msk.bf16.mxu1 %vm993_vm1, %v1223_v15  ;;  %3778 = vmatpush3.bf16.msra.mxu1 %v4033_v24  ;;  %v4035_v15 = vld [vmem:[%s4939_s22 + $0x20] sm:$0xff]  }
 0x7e4   : > { %3779 = vmatprep.subr.bf16.mxu1 %v4034_v61 }
 0x7e7   : > { %3780 = vmatpush3.bf16.msra.mxu1 %v4034_v61 }
 0x7e8   : > { %3797 = vmatprep.subr.bf16.mxu1 %v4497_v37 }
 0x7ee   : > { %3782 = vmatmul.mubr.msk.bf16.vlgmr.msra.gmra.mrb[20].mxu1 %vm993_vm1, %v1224_v54 }
 0x7ef   : > { %3799 = vmatprep.mubr.msk.bf16.mxu1 %vm4498_vm0, %v4497_v37 }
 0x836   : > { %v1745_v41 = vpop.xlane.xlu1 %1744 }
 0x837   : > { %4159 = vrcp.f32 %v1745_v41 }
 0x83a   : > { %v1813_v43 = vpop.permute.xlu1 %1812  ;;  %v1748_v48 = vpop.xlane.xlu0 %1747 }
 0x83b   : > { %4161 = vrcp.f32 %v1748_v48  ;;  %3804 = vmatpush3.bf16.msra.mxu0 %v1813_v43 }
 0x83c   : > { %3817 = vmatprep.subr.bf16.mxu0 %v4497_v37 }
 0x83e   : > { %v1751_v50 = vpop.xlane.xlu0 %1750 }
 0x83f   : > { %4163 = vrcp.f32 %v1751_v50 }
 0x841   : > { %v4160_v14 = vpop.eup %4159 }
 0x842   : > { %v1754_v12 = vpop.xlane.xlu0 %1753  ;;  %v1759_v53 = vmul.f32 %v4160_v14, %v4152_v36 }
 0x843   : > { %4165 = vrcp.f32 %v1754_v12 }
 0x845   : > { %v4162_v51 = vpop.eup %4161 }
 0x846   : > { %v1760_v54 = vmul.f32 %v4162_v51, %v4154_v40  ;;  %v1766_v60 = vpop.permute.xlu0 %1765 }
 0x847   : > { %3798 = vmatpush3.bf16.msra.mxu1 %v1766_v60 }
 0x848   : > { %v1763_v62 = vpack.c.bf16 %v1760_v54, %v1759_v53  ;;  %3809 = vmatprep.subr.bf16.mxu1 %v4035_v15 }
 0x849   : > { %v4164_v63 = vpop.eup %4163 }
 0x84a   : > { %3800 = vmatmul.mubr.msk.bf16.vlgmr.msra.gmra.mrb[24].mxu1 %vm1088_vm2, %v1763_v62  ;;  %v1939_v1 = vpop.permute.xlu0 %1938  ;;  %v1761_v2 = vmul.f32 %v4164_v63, %v4156_v44 }
 0x84b   : > { %3810 = vmatpush3.bf16.msra.mxu1 %v4035_v15  ;;  %v1944_v5 = vsel %vm993_vm1, %v1939_v1, 0 }
 0x84c   : > { %3811 = vmatprep.subr.bf16.mxu1 %v4036_v9 }
 0x84d   : > { %v4166_v0 = vpop.eup %4165 }
 0x84e   : > { %v1762_v3 = vmul.f32 %v4166_v0, %v4158_v46  ;;  %v1990_v6 = vpop.permute.xlu0 %1989 }
 0x84f   : > { %3812 = vmatpush3.bf16.msra.mxu1 %v4036_v9  ;;  %v1995_v23 = vsel %vm993_vm1, %v1990_v6, 0  ;;  %v4037_v6 = vld [vmem:[%s4939_s22 + $0x30] sm:$0xff]  }
 0x850   : > { %v1764_v4 = vpack.c.bf16 %v1762_v3, %v1761_v2  ;;  %3823 = vmatprep.subr.bf16.mxu1 %v4497_v37 }
 0x852   : > { %3806 = vmatmul.mubr.msk.bf16.vlgmr.msra.gmra.mrb[32].mxu0 %vm1088_vm2, %v1764_v4  ;;  %v1937_v7 = vpop.permute.xlu0 %1936 }
 0x853   : > { %3818 = vmatpush3.bf16.xpose.msra.mxu0 %v1944_v5  ;;  %3819 = vmatprep.mubr.msk.bf16.mxu0 %vm4498_vm0, %v4497_v37 }
 0x854   : > { %3829 = vmatprep.subr.bf16.mxu0 %v4497_v37 }
 0x856   : > { %v1988_v30 = vpop.permute.xlu0 %1987 }
 0x85a   : > { %3820 = vmatmul.mubr.msk.bf16.vlgmr.msra.gmra.mrb[36].mxu0 %vm993_vm1, %v1937_v7  ;;  %v4038_v7 = vld [vmem:[%s4939_s22 + $0x38] sm:$0xff]   ;;  %s5534_s22 = sld [smem:[#allocation37_spill]] }
 0x85b   : > { %3831 = vmatprep.mubr.msk.bf16.mxu0 %vm4498_vm0, %v4497_v37 }
 0x91d   : > { %v1805_v10 = vpop.f32.mrb[24].mxu1 }
 0x91e   : > { %v3801_v11 = vpop.f32.mrb[25].mxu1 }
 0x91f   : > { %v1808_v13 = vpop.f32.mrb[26].mxu1 }
 0x920   : > { %v1859_v16 = vpack.c.bf16 %v1808_v13, %v1805_v10  ;;  %v3802_v17 = vpop.f32.mrb[27].mxu1 }
 0x922   : > { %3813 = vmatprep.mubr.msk.bf16.mxu1 %vm993_vm1, %v1859_v16 }
 0x925   : > { %v1852_v18 = vpop.f32.mrb[32].mxu0 }
 0x926   : > { %v3807_v19 = vpop.f32.mrb[33].mxu0 }
 0x927   : > { %v1855_v20 = vpop.f32.mrb[34].mxu0 }
 0x928   : > { %v1860_v21 = vpack.c.bf16 %v1855_v20, %v1852_v18  ;;  %v3808_v22 = vpop.f32.mrb[35].mxu0 }
 0x929   : > { %v3475_v22 = vld [vmem:[%s5533_s28] ss:$0 sm:$0xff] }
 0x92a   : > { %3814 = vmatmul.mubr.msk.bf16.vlgmr.msra.gmra.mrb[20].mxu1 %vm993_vm1, %v1860_v21 }
 0x92b   : > { %3824 = vmatpush3.bf16.xpose.msra.mxu1 %v1995_v23  ;;  %3825 = vmatprep.mubr.msk.bf16.mxu1 %vm4498_vm0, %v4497_v37 }
 0x92c   : > { %3835 = vmatprep.subr.bf16.mxu1 %v4497_v37 }
 0x92d   : > { %v1980_v24 = vpop.f32.mrb[36].mxu0 }
 0x92e   : > { %v3821_v25 = vpop.f32.mrb[37].mxu0  ;;  %v2038_v26 = vsel %vm1088_vm2, %v1980_v24, -inf }
 0x92f   : > { %2039 = vmax.xlane.f32.xlu0 %v2038_v26  ;;  %v1983_v27 = vpop.f32.mrb[38].mxu0 }
 0x930   : > { %v3822_v28 = vpop.f32.mrb[39].mxu0  ;;  %v2041_v29 = vsel %vm1088_vm2, %v1983_v27, -inf }
 0x931   : > { %2042 = vmax.xlane.f32.xlu1 %v2041_v29 }
 0x932   : > { %3826 = vmatmul.mubr.msk.bf16.vlgmr.msra.gmra.mrb[28].mxu1 %vm993_vm1, %v1988_v30  ;;  %v4199_v30 = vld [vmem:[#allocation2] sm:$0xff] }
 0x933   : > { %3837 = vmatprep.mubr.msk.bf16.mxu1 %vm4498_vm0, %v4497_v37 }
 0x9bc   : > { %v2040_v31 = vpop.xlane.xlu0 %2039 }
 0x9bd   : > { %v2050_v32 = vsub.f32 %v1980_v24, %v2040_v31 }
 0x9be   : > { %v2043_v36 = vpop.xlane.xlu1 %2042 }
 0x9bf   : > { %v2054_v33 = vmul.f32 1.442695, %v2050_v32  ;;  %v2051_v38 = vsub.f32 %v1983_v27, %v2043_v36 }
 0x9c1   : > { %4167 = vpow2.f32 %v2054_v33  ;;  %v2056_v39 = vmul.f32 1.442695, %v2051_v38  ;;  %v4200_v33 = vld [vmem:[#allocation2 + $0x8] sm:$0xff]  ;;  %v4202_v38 = vld [vmem:[#allocation2 + $0x18] sm:$0xff] }
 0x9c3   : > { %4169 = vpow2.f32 %v2056_v39 }
 0x9cb   : > { %v4168_v34 = vpop.eup %4167 }
 0x9cc   : > { %v2062_v35 = vsel %vm1088_vm2, %v4168_v34, 0.0 }
 0x9cd   : > { %2063 = vadd.xlane.f32.xlu1 %v2062_v35  ;;  %v4170_v47 = vpop.eup %4169  ;;  %v4201_v35 = vld [vmem:[#allocation2 + $0x10] sm:$0xff] }
 0x9ce   : > { %v2065_v49 = vsel %vm1088_vm2, %v4170_v47, 0.0 }
 0xa05   : > { %v2031_v40 = vpop.f32.mrb[28].mxu1 }
 0xa06   : > { %v3827_v42 = vpop.f32.mrb[29].mxu1  ;;  %v2044_v44 = vsel %vm1088_vm2, %v2031_v40, -inf }
 0xa07   : > { %v2034_v45 = vpop.f32.mrb[30].mxu1  ;;  %2045 = vmax.xlane.f32.xlu0 %v2044_v44  ;;  %v4041_v42 = vld [vmem:[%s4941_s21 + $0x4] ss:$16 sps:$4 sm:$0xff]   ;;  %v4042_v44 = vld [vmem:[%s4941_s21 + $0x8] ss:$16 sps:$4 sm:$0xff]  }
 0xa08   : > { %v3828_v46 = vpop.f32.mrb[31].mxu1  ;;  %v2047_v37 = vsel %vm1088_vm2, %v2034_v45, -inf }
 0xa09   : > { %v4047_v46 = vld [vmem:[%s4941_s21 + $0x24] ss:$16 sps:$4 sm:$0xff]  }
 0xa0b   : > { %2048 = vmax.xlane.f32.xlu0 %v2047_v37  ;;  %v4050_v37 = vld [vmem:[%s4941_s21 + $0x2c] ss:$16 sps:$4 sm:$0xff]  }
 0xa0f   : > { %2066 = vadd.xlane.f32.xlu0 %v2065_v49  ;;  %v4048_v49 = vld [vmem:[%s4941_s21 + $0x28] ss:$16 sps:$4 sm:$0xff]  }
 0xa5a   : > { %v2064_v15 = vpop.xlane.xlu1 %2063 }
 0xa94   : > { %v2046_v52 = vpop.xlane.xlu0 %2045 }
 0xa95   : > { %v2052_v56 = vsub.f32 %v2031_v40, %v2046_v52  ;;  %v4039_v40 = vld [vmem:[%s4941_s21] ss:$16 sps:$4 sm:$0xff]  }
 0xa97   : > { %v2058_v58 = vmul.f32 1.442695, %v2052_v56 }
 0xa98   : > { %v2049_v59 = vpop.xlane.xlu0 %2048 }
 0xa99   : > { %4171 = vpow2.f32 %v2058_v58  ;;  %v2053_v61 = vsub.f32 %v2034_v45, %v2049_v59  ;;  %v4044_v45 = vld [vmem:[%s4941_s21 + $0xc] ss:$16 sps:$4 sm:$0xff]  }
 0xa9b   : > { %v2060_v41 = vmul.f32 1.442695, %v2053_v61 }
 0xa9c   : > { %v2067_v14 = vpop.xlane.xlu0 %2066 }
 0xa9d   : > { %4173 = vpow2.f32 %v2060_v41 }
 0xa9e   : > { %4175 = vrcp.f32 %v2067_v14 }
 0xa9f   : > { %4177 = vrcp.f32 %v2064_v15 }
 0xaa3   : > { %v4172_v43 = vpop.eup %4171 }
 0xaa4   : > { %v2068_v48 = vsel %vm1088_vm2, %v4172_v43, 0.0 }
 0xaa5   : > { %2069 = vadd.xlane.f32.xlu1 %v2068_v48 }
 0xaa7   : > { %v4174_v50 = vpop.eup %4173 }
 0xaa8   : > { %v2071_v12 = vsel %vm1088_vm2, %v4174_v50, 0.0  ;;  %v4176_v51 = vpop.eup %4175 }
 0xaa9   : > { %2072 = vadd.xlane.f32.xlu0 %v2071_v12  ;;  %v4178_v54 = vpop.eup %4177  ;;  %v2079_v60 = vmul.f32 %v4176_v51, %v4170_v47  ;;  %v4045_v47 = vld [vmem:[%s4941_s21 + $0x20] ss:$16 sps:$4 sm:$0xff]  }
 0xaaa   : > { %v2078_v62 = vmul.f32 %v4178_v54, %v4168_v34 }
 0xab6   : > { %2084 = vrot.lane.b32.xlu1 %v5041_v57, %s4501_s3  ;;  %v2082_v57 = vpack.c.bf16 %v2079_v60, %v2078_v62  ;;  %v4053_v62 = vld [vmem:[%s4941_s21 + $0x44] ss:$16 sps:$4 sm:$0xff]  }
 0xabf   : > { %2131 = vrot.lane.b32.xlu0 %v5037_v55, %s4501_s3 }
 0xb32   : > { %v2070_v53 = vpop.xlane.xlu1 %2069 }
 0xb33   : > { %4179 = vrcp.f32 %v2070_v53 }
 0xb36   : > { %v2073_v63 = vpop.xlane.xlu0 %2072  ;;  %v2085_v0 = vpop.permute.xlu1 %2084 }
 0xb37   : > { %4181 = vrcp.f32 %v2073_v63  ;;  %3830 = vmatpush3.bf16.msra.mxu0 %v2085_v0  ;;  %v4056_v63 = vld [vmem:[%s4941_s21 + $0x4c] ss:$16 sps:$4 sm:$0xff]   ;;  %v4051_v0 = vld [vmem:[%s4941_s21 + $0x40] ss:$16 sps:$4 sm:$0xff]  }
 0xb38   : > { %2553 = vmatprep.subr.bf16.mxu0 %v4041_v42 }
 0xb3a   : > { %v2132_v1 = vpop.permute.xlu0 %2131  ;;  %3832 = vmatmul.mubr.msk.bf16.vlgmr.msra.gmra.mrb[40].mxu0 %vm1088_vm2, %v2082_v57  ;;  %v4054_v57 = vld [vmem:[%s4941_s21 + $0x48] ss:$16 sps:$4 sm:$0xff]  }
 0xb3b   : > { %3836 = vmatpush3.bf16.msra.mxu1 %v2132_v1  ;;  %2585 = vmatprep.mubr.bf16.mxu0 %v4496_v8  ;;  %v4059_v1 = vld [vmem:[%s4941_s21 + $0x64] ss:$16 sps:$4 sm:$0xff]  }
 0xb3c   : > { %3841 = vmatprep.subr.bf16.mxu1 %v4037_v6  ;;  %2554 = vmatpush1.bf16.msra.mxu0 %v4039_v40 }
 0xb3d   : > { %v4180_v55 = vpop.eup %4179  ;;  %2555 = vmatprep.subr.bf16.mxu0 %v4047_v46 }
 0xb3e   : > { %v2080_v3 = vmul.f32 %v4180_v55, %v4172_v43  ;;  %v4062_v55 = vld [vmem:[%s4941_s21 + $0x6c] ss:$16 sps:$4 sm:$0xff]  }
 0xb40   : > { %2556 = vmatpush1.bf16.msra.mxu0 %v4045_v47  ;;  %v3477_v47 = vld [vmem:[%s687_s12] ss:$0 sm:$0xff] }
 0xb41   : > { %v4182_v2 = vpop.eup %4181  ;;  %2557 = vmatprep.subr.bf16.mxu0 %v4053_v62  ;;  %v4096_v62 = vld [vmem:[%s4981_s11 + $0xd0] sm:$0xff]  }
 0xb42   : > { %v2081_v4 = vmul.f32 %v4182_v2, %v4174_v50  ;;  %v4057_v2 = vld [vmem:[%s4941_s21 + $0x60] ss:$16 sps:$4 sm:$0xff]  }
 0xb44   : > { %v2083_v5 = vpack.c.bf16 %v2081_v4, %v2080_v3  ;;  %2558 = vmatpush1.bf16.msra.mxu0 %v4051_v0  ;;  %v4060_v3 = vld [vmem:[%s4941_s21 + $0x68] ss:$16 sps:$4 sm:$0xff]   ;;  %v4065_v4 = vld [vmem:[%s4941_s21 + $0x84] ss:$16 sps:$4 sm:$0xff]  }
 0xb45   : > { %2559 = vmatprep.subr.bf16.mxu0 %v4059_v1  ;;  %v4099_v1 = vld [vmem:[%s4981_s11 + $0x58] sm:$0xff]  }
 0xb46   : > { %3838 = vmatmul.mubr.msk.bf16.vlgmr.msra.gmra.mrb[32].mxu1 %vm1088_vm2, %v2083_v5  ;;  %v4068_v5 = vld [vmem:[%s4941_s21 + $0x8c] ss:$16 sps:$4 sm:$0xff]  }
 0xb47   : > { %3842 = vmatpush3.bf16.msra.mxu1 %v4037_v6  ;;  %v4063_v6 = vld [vmem:[%s4941_s21 + $0x80] ss:$16 sps:$4 sm:$0xff]  }
 0xb48   : > { %3843 = vmatprep.subr.bf16.mxu1 %v4038_v7  ;;  %2560 = vmatpush1.bf16.msra.mxu0 %v4057_v2  ;;  %v4101_v2 = vld [vmem:[%s4981_s11 + $0x18] sm:$0xff]  }
 0xb49   : > { %2561 = vmatprep.subr.bf16.mxu0 %v4065_v4  ;;  %v4103_v4 = vld [vmem:[%s4981_s11 + $0x60] sm:$0xff]  }
 0xb4b   : > { %3844 = vmatpush3.bf16.msra.mxu1 %v4038_v7  ;;  %v4066_v7 = vld [vmem:[%s4941_s21 + $0x88] ss:$16 sps:$4 sm:$0xff]  }
 0xb4c   : > { %2606 = vmatprep.subr.bf16.mxu1 %v4044_v45  ;;  %2562 = vmatpush1.bf16.msra.mxu0 %v4063_v6  ;;  %v4105_v6 = vld [vmem:[%s4981_s11 + $0x20] sm:$0xff]  }
 0xc0d   : > { %v2124_v9 = vpop.f32.mrb[40].mxu0 }
 0xc0e   : > { %v3833_v10 = vpop.f32.mrb[41].mxu0 }
 0xc0f   : > { %v2127_v11 = vpop.f32.mrb[42].mxu0  ;;  %v4074_v10 = vld [vmem:[%s4941_s21 + $0xac] ss:$16 sps:$4 sm:$0xff]  }
 0xc10   : > { %v2178_v13 = vpack.c.bf16 %v2127_v11, %v2124_v9  ;;  %v3834_v16 = vpop.f32.mrb[43].mxu0  ;;  %v4071_v9 = vld [vmem:[%s4941_s21 + $0xa4] ss:$16 sps:$4 sm:$0xff]   ;;  %v4069_v11 = vld [vmem:[%s4941_s21 + $0xa0] ss:$16 sps:$4 sm:$0xff]  }
 0xc11   : > { %2563 = vmatprep.subr.bf16.mxu0 %v4071_v9  ;;  %v4077_v16 = vld [vmem:[%s4941_s21 + $0xc4] ss:$16 sps:$4 sm:$0xff]   ;;  %v4107_v9 = vld [vmem:[%s4981_s11 + $0x68] sm:$0xff]  }
 0xc12   : > { %3845 = vmatprep.mubr.msk.bf16.mxu1 %vm993_vm1, %v2178_v13  ;;  %v4072_v13 = vld [vmem:[%s4941_s21 + $0xa8] ss:$16 sps:$4 sm:$0xff]   ;;  %2564 = vmatpush1.bf16.msra.mxu0 %v4069_v11 }
 0xc13   : > { %2565 = vmatprep.subr.bf16.mxu0 %v4077_v16  ;;  %v4109_v11 = vld [vmem:[%s4981_s11 + $0x28] sm:$0xff]   ;;  %v4111_v16 = vld [vmem:[%s4981_s11 + $0x70] sm:$0xff]  }
 0xc19   : > { %v2171_v17 = vpop.f32.mrb[32].mxu1 }
 0xc1a   : > { %v3839_v18 = vpop.f32.mrb[33].mxu1 }
 0xc1b   : > { %v2174_v19 = vpop.f32.mrb[34].mxu1  ;;  %v4075_v18 = vld [vmem:[%s4941_s21 + $0xc0] ss:$16 sps:$4 sm:$0xff]  }
 0xc1c   : > { %v2179_v20 = vpack.c.bf16 %v2174_v19, %v2171_v17  ;;  %v3840_v21 = vpop.f32.mrb[35].mxu1  ;;  %v4080_v17 = vld [vmem:[%s4941_s21 + $0xcc] ss:$16 sps:$4 sm:$0xff]   ;;  %v4078_v19 = vld [vmem:[%s4941_s21 + $0xc8] ss:$16 sps:$4 sm:$0xff]   ;;  %2566 = vmatpush1.bf16.msra.mxu0 %v4075_v18  ;;  %v4113_v18 = vld [vmem:[%s4981_s11 + $0x30] sm:$0xff]  }
 0xc1d   : > { %v4086_v21 = vld [vmem:[%s4941_s21 + $0xec] ss:$16 sps:$4 sm:$0xff]  }
 0xc1e   : > { %3846 = vmatmul.mubr.msk.bf16.vlgmr.msra.gmra.mrb[20].mxu1 %vm993_vm1, %v2179_v20  ;;  %v4083_v20 = vld [vmem:[%s4941_s21 + $0xe4] ss:$16 sps:$4 sm:$0xff]  }
 0xc1f   : > { %2638 = vmatprep.mubr.bf16.mxu1 %v4496_v8  ;;  %2607 = vmatpush1.bf16.msra.mxu1 %v4042_v44 }
 0xc20   : > { %2608 = vmatprep.subr.bf16.mxu1 %v4050_v37  ;;  %2567 = vmatprep.subr.bf16.mxu0 %v4083_v20  ;;  %v4115_v20 = vld [vmem:[%s4981_s11 + $0x78] sm:$0xff]  }
 0xc23   : > { %2609 = vmatpush1.bf16.msra.mxu1 %v4048_v49 }
 0xc24   : > { %2610 = vmatprep.subr.bf16.mxu1 %v4056_v63 }
 0xc27   : > { %2611 = vmatpush1.bf16.msra.mxu1 %v4054_v57  ;;  %v4098_v57 = vld [vmem:[%s4981_s11 + $0x90] sm:$0xff]  }
 0xc28   : > { %2612 = vmatprep.subr.bf16.mxu1 %v4062_v55  ;;  %v4100_v55 = vld [vmem:[%s4981_s11 + $0xd8] sm:$0xff]  }
 0xc2b   : > { %2613 = vmatpush1.bf16.msra.mxu1 %v4060_v3  ;;  %v4102_v3 = vld [vmem:[%s4981_s11 + $0x98] sm:$0xff]  }
 0xc2c   : > { %2614 = vmatprep.subr.bf16.mxu1 %v4068_v5  ;;  %v4104_v5 = vld [vmem:[%s4981_s11 + $0xe0] sm:$0xff]  }
 0xc2f   : > { %2615 = vmatpush1.bf16.msra.mxu1 %v4066_v7  ;;  %v4106_v7 = vld [vmem:[%s4981_s11 + $0xa0] sm:$0xff]  }
 0xc30   : > { %2616 = vmatprep.subr.bf16.mxu1 %v4074_v10  ;;  %v4108_v10 = vld [vmem:[%s4981_s11 + $0xe8] sm:$0xff]  }
 0xc33   : > { %2617 = vmatpush1.bf16.msra.mxu1 %v4072_v13  ;;  %v4110_v13 = vld [vmem:[%s4981_s11 + $0xa8] sm:$0xff]  }
 0xc34   : > { %2618 = vmatprep.subr.bf16.mxu1 %v4080_v17  ;;  %v4112_v17 = vld [vmem:[%s4981_s11 + $0xf0] sm:$0xff]  }
 0xc37   : > { %2619 = vmatpush1.bf16.msra.mxu1 %v4078_v19  ;;  %v4114_v19 = vld [vmem:[%s4981_s11 + $0xb0] sm:$0xff]  }
 0xc38   : > { %2620 = vmatprep.subr.bf16.mxu1 %v4086_v21  ;;  %v4116_v21 = vld [vmem:[%s4981_s11 + $0xf8] sm:$0xff]  }
 0xcf1   : > { %v3847_v23 = vpop.f32.mrb[20].mxu1 }
 0xcf2   : > { %v2236_v24 = vpop.f32.mrb[21].mxu1  ;;  %v2264_v28 = vadd.f32 %v3847_v23, %v3475_v22  ;;  %v4084_v23 = vld [vmem:[%s4941_s21 + $0xe8] ss:$16 sps:$4 sm:$0xff]  }
 0xcf3   : > { %v2262_v25 = vadd.f32 %v3475_v22, %v2236_v24  ;;  %v3848_v26 = vpop.f32.mrb[22].mxu1  ;;  %2621 = vmatpush1.bf16.msra.mxu1 %v4084_v23  ;;  %v4087_v24 = vld [vmem:[%s4981_s11 + $0x40] sm:$0xff]   ;;  %v4118_v23 = vld [vmem:[%s4981_s11 + $0xb8] sm:$0xff]  }
 0xcf4   : > { %v2239_v27 = vpop.f32.mrb[23].mxu1  ;;  %v2265_v32 = vadd.f32 %v3848_v26, %v3475_v22  ;;  %v2268_v36 = vadd.f32 %v4201_v35, %v2264_v28 }
 0xcf5   : > { %v2263_v29 = vadd.f32 %v3475_v22, %v2239_v27  ;;  %v2266_v31 = vadd.f32 %v4199_v30, %v2262_v25  ;;  %v4081_v22 = vld [vmem:[%s4941_s21 + $0xe0] ss:$16 sps:$4 sm:$0xff]   ;;  %s5535_s21 = scalar_lea.vmem %s5534_s22, %s4949_s23 }
 0xcf6   : > { %v2269_v39 = vadd.f32 %v4202_v38, %v2265_v32  ;;  %2568 = vmatpush1.bf16.msra.mxu0 %v4081_v22  ;;  %v4088_v25 = vld [vmem:[%s4981_s11 + $0xc0] sm:$0xff]   ;;  %v4117_v22 = vld [vmem:[%s4981_s11 + $0x38] sm:$0xff]  }
 0xcf7   : > { %2272 = vadd.xlane.f32.xlu1 %v2266_v31  ;;  %v2267_v34 = vadd.f32 %v4200_v33, %v2263_v29  ;;  %3645 = vmatprep.subr.bf16.mxu0 %v4087_v24  ;;  %v3476_v40 = vld [vmem:[%s5535_s21] ss:$0 sm:$0xff]  ;;  %v2373_v24 = vlaneseq }
 0xcf8   : > { %3673 = vmatprep.subr.bf16.mxu1 %v4088_v25 }
 0xcf9   : > { %2274 = vadd.xlane.f32.xlu0 %v2267_v34  ;;  %v2374_v25 = vshrl.u32 %v2373_v24, 7 }
 0xcfb   : > { %2276 = vadd.xlane.f32.xlu1 %v2268_v36 }
 0xcfd   : > { %2278 = vadd.xlane.f32.xlu0 %v2269_v39 }
 0xd84   : > { %v2273_v52 = vpop.xlane.xlu1 %2272 }
 0xd85   : > { %v2281_v56 = vmul.f32 0.0078125, %v2273_v52 }
 0xd86   : > { %v2275_v58 = vpop.xlane.xlu0 %2274 }
 0xd87   : > { %v5232_v59 = vsub.f32 %v2266_v31, %v2281_v56  ;;  %v2282_v61 = vmul.f32 0.0078125, %v2275_v58 }
 0xd88   : > { %v2277_v41 = vpop.xlane.xlu1 %2276 }
 0xd89   : > { %v5234_v43 = vsub.f32 %v2267_v34, %v2282_v61  ;;  %v2283_v48 = vmul.f32 0.0078125, %v2277_v41  ;;  %v2289_v50 = vmul.f32 %v5232_v59, %v5232_v59 }
 0xd8a   : > { %v2279_v12 = vpop.xlane.xlu0 %2278 }
 0xd8b   : > { %v5238_v14 = vsub.f32 %v2268_v36, %v2283_v48  ;;  %v2284_v15 = vmul.f32 0.0078125, %v2279_v12  ;;  %2293 = vadd.xlane.f32.xlu1 %v2289_v50  ;;  %v2290_v51 = vmul.f32 %v5234_v43, %v5234_v43  ;;  %v4089_v48 = vld [vmem:[%s4981_s11] sm:$0xff]   ;;  %v4091_v12 = vld [vmem:[%s4981_s11 + $0x48] sm:$0xff]  }
 0xd8c   : > { %v4090_v50 = vld [vmem:[%s4981_s11 + $0x80] sm:$0xff]  }
 0xd8d   : > { %v5242_v53 = vsub.f32 %v2269_v39, %v2284_v15  ;;  %2295 = vadd.xlane.f32.xlu0 %v2290_v51  ;;  %v2291_v54 = vmul.f32 %v5238_v14, %v5238_v14  ;;  %v4092_v15 = vld [vmem:[%s4981_s11 + $0xc8] sm:$0xff]  }
 0xd8f   : > { %2297 = vadd.xlane.f32.xlu1 %v2291_v54  ;;  %v2292_v60 = vmul.f32 %v5242_v53, %v5242_v53  ;;  %v4094_v54 = vld [vmem:[%s4981_s11 + $0x88] sm:$0xff]  }
 0xd91   : > { %2299 = vadd.xlane.f32.xlu0 %v2292_v60  ;;  %v4095_v60 = vld [vmem:[%s4981_s11 + $0x50] sm:$0xff]  }
 0xe18   : > { %v2294_v26 = vpop.xlane.xlu1 %2293 }
 0xe19   : > { %v2301_v27 = vmul.f32 0.0078125, %v2294_v26  ;;  %v2375_v26 = vsub.s32 0, %v2374_v25 }
 0xe1a   : > { %v2296_v28 = vpop.xlane.xlu0 %2295 }
 0xe1b   : > { %v2305_v29 = vadd.f32 1e-05, %v2301_v27  ;;  %v2302_v30 = vmul.f32 0.0078125, %v2296_v28  ;;  %v2383_v27 = vsub.s32 2, %v2374_v25  ;;  %v2371_v28 = vld [vmem:[%s4967_s26] sm:$0xf] }
 0xe1c   : > { %v2298_v31 = vpop.xlane.xlu1 %2297 }
 0xe1d   : > { %4183 = vrsqrt.f32 %v2305_v29  ;;  %v2306_v32 = vadd.f32 1e-05, %v2302_v30  ;;  %v2303_v33 = vmul.f32 0.0078125, %v2298_v31  ;;  %v2379_v29 = vsub.s32 1, %v2374_v25 }
 0xe1e   : > { %v2300_v34 = vpop.xlane.xlu0 %2299  ;;  %v2387_v30 = vsub.s32 3, %v2374_v25  ;;  %v2376_v31 = vrot.slane %v2371_v28, %v2375_v26 }
 0xe1f   : > { %4185 = vrsqrt.f32 %v2306_v32  ;;  %v2307_v35 = vadd.f32 1e-05, %v2303_v33  ;;  %v2304_v36 = vmul.f32 0.0078125, %v2300_v34  ;;  %v2384_v32 = vrot.slane %v2371_v28, %v2383_v27 }
 0xe20   : > { %v2380_v33 = vrot.slane %v2371_v28, %v2379_v29  ;;  %v2388_v34 = vrot.slane %v2371_v28, %v2387_v30 }
 0xe21   : > { %4187 = vrsqrt.f32 %v2307_v35  ;;  %v2308_v38 = vadd.f32 1e-05, %v2304_v36 }
 0xe23   : > { %4189 = vrsqrt.f32 %v2308_v38 }
 0xe27   : > { %v4184_v39 = vpop.eup %4183 }
 0xe28   : > { %v2313_v42 = vmul.f32 %v4184_v39, %v5232_v59 }
 0xe29   : > { %v4186_v44 = vpop.eup %4185 }
 0xe2a   : > { %v2314_v45 = vmul.f32 %v4186_v44, %v5234_v43  ;;  %v2323_v46 = vmul.f32 %v3476_v40, %v2313_v42 }
 0xe2b   : > { %v4188_v37 = vpop.eup %4187 }
 0xe2c   : > { %v2324_v49 = vmul.f32 %v3476_v40, %v2314_v45  ;;  %v5286_v56 = vadd.f32 %v3477_v47, %v2323_v46  ;;  %v2315_v59 = vmul.f32 %v4188_v37, %v5238_v14 }
 0xe2d   : > { %v4190_v52 = vpop.eup %4189 }
 0xe2e   : > { %v5288_v58 = vadd.f32 %v3477_v47, %v2324_v49  ;;  %v2316_v61 = vmul.f32 %v4190_v52, %v5242_v53  ;;  %v2325_v51 = vmul.f32 %v3476_v40, %v2315_v59  ;;  %v4093_v53 = vld [vmem:[%s4981_s11 + $0x8] sm:$0xff]  }
 0xe30   : > { %v2337_v41 = vpack.c.bf16 %v5288_v58, %v5286_v56  ;;  %v2326_v43 = vmul.f32 %v3476_v40, %v2316_v61  ;;  %v5306_v63 = vadd.f32 %v3477_v47, %v2325_v51 }
 0xe32   : > { %2586 = vmatmul.mubr.bf16.vlgmr.msra.gmra.mrb[44].mxu0 %v2337_v41  ;;  %2639 = vmatmul.mubr.bf16.vlgmr.msra.gmra.mrb[36].mxu1 %v2337_v41  ;;  %v5300_v14 = vadd.f32 %v3477_v47, %v2326_v43 }
 0xe33   : > { %2595 = vmatprep.mubr.bf16.mxu0 %v4496_v8  ;;  %2648 = vmatprep.mubr.bf16.mxu1 %v4496_v8  ;;  %v4097_v8 = vld [vmem:[%s4981_s11 + $0x10] sm:$0xff]  }
 0xe34   : > { %3646 = vmatpush3.bf16.msra.mxu0 %v4089_v48  ;;  %3674 = vmatpush3.bf16.msra.mxu1 %v4090_v50  ;;  %v2338_v0 = vpack.c.bf16 %v5300_v14, %v5306_v63 }
 0xe35   : > { %3647 = vmatprep.subr.bf16.mxu0 %v4091_v12  ;;  %3675 = vmatprep.subr.bf16.mxu1 %v4092_v15 }
 0xe38   : > { %3648 = vmatpush3.bf16.msra.mxu0 %v4093_v53  ;;  %3676 = vmatpush3.bf16.msra.mxu1 %v4094_v54 }
 0xe39   : > { %3649 = vmatprep.subr.bf16.mxu0 %v4095_v60  ;;  %3677 = vmatprep.subr.bf16.mxu1 %v4096_v62 }
 0xe3a   : > { %2596 = vmatmul.mubr.bf16.gmra.mrb[48].mxu0 %v2338_v0  ;;  %2649 = vmatmul.mubr.bf16.gmra.mrb[40].mxu1 %v2338_v0 }
 0xe3c   : > { %3650 = vmatpush3.bf16.msra.mxu0 %v4097_v8  ;;  %3678 = vmatpush3.bf16.msra.mxu1 %v4098_v57 }
 0xe3d   : > { %3651 = vmatprep.subr.bf16.mxu0 %v4099_v1  ;;  %3679 = vmatprep.subr.bf16.mxu1 %v4100_v55 }
 0xe40   : > { %3652 = vmatpush3.bf16.msra.mxu0 %v4101_v2  ;;  %3680 = vmatpush3.bf16.msra.mxu1 %v4102_v3 }
 0xe41   : > { %3653 = vmatprep.subr.bf16.mxu0 %v4103_v4  ;;  %3681 = vmatprep.subr.bf16.mxu1 %v4104_v5 }
 0xe44   : > { %3654 = vmatpush3.bf16.msra.mxu0 %v4105_v6  ;;  %3682 = vmatpush3.bf16.msra.mxu1 %v4106_v7 }
 0xe45   : > { %3655 = vmatprep.subr.bf16.mxu0 %v4107_v9  ;;  %3683 = vmatprep.subr.bf16.mxu1 %v4108_v10 }
 0xe48   : > { %3656 = vmatpush3.bf16.msra.mxu0 %v4109_v11  ;;  %3684 = vmatpush3.bf16.msra.mxu1 %v4110_v13 }
 0xe49   : > { %3657 = vmatprep.subr.bf16.mxu0 %v4111_v16  ;;  %3685 = vmatprep.subr.bf16.mxu1 %v4112_v17 }
 0xe4c   : > { %3658 = vmatpush3.bf16.msra.mxu0 %v4113_v18  ;;  %3686 = vmatpush3.bf16.msra.mxu1 %v4114_v19 }
 0xe4d   : > { %3659 = vmatprep.subr.bf16.mxu0 %v4115_v20  ;;  %3687 = vmatprep.subr.bf16.mxu1 %v4116_v21 }
 0xe50   : > { %3660 = vmatpush3.bf16.msra.mxu0 %v4117_v22  ;;  %3688 = vmatpush3.bf16.msra.mxu1 %v4118_v23 }
 0xf05   : > { %v2587_v35 = vpop.f32.mrb[44].mxu0  ;;  %v2640_v36 = vpop.f32.mrb[36].mxu1 }
 0xf06   : > { %v2588_v38 = vadd.f32 %v2587_v35, %v2376_v31  ;;  %v2641_v39 = vadd.f32 %v2640_v36, %v2384_v32  ;;  %v2589_v40 = vpop.f32.mrb[45].mxu0  ;;  %v2642_v42 = vpop.f32.mrb[37].mxu1 }
 0xf07   : > { %v2590_v44 = vadd.f32 %v2589_v40, %v2380_v33  ;;  %v2643_v45 = vadd.f32 %v2642_v42, %v2388_v34  ;;  %v2591_v46 = vpop.f32.mrb[46].mxu0  ;;  %v2644_v37 = vpop.f32.mrb[38].mxu1 }
 0xf08   : > { %v2592_v47 = vadd.f32 %v2591_v46, %v2376_v31  ;;  %v2645_v49 = vadd.f32 %v2644_v37, %v2384_v32  ;;  %v2593_v52 = vpop.f32.mrb[47].mxu0  ;;  %v2646_v59 = vpop.f32.mrb[39].mxu1  ;;  %v2659_v43 = vmax.f32 %v2588_v38, 0.0  ;;  %v2661_v48 = vmax.f32 %v2641_v39, 0.0 }
 0xf09   : > { %v2594_v61 = vadd.f32 %v2593_v52, %v2380_v33  ;;  %v2647_v41 = vadd.f32 %v2646_v59, %v2388_v34  ;;  %v2660_v15 = vmax.f32 %v2590_v44, 0.0  ;;  %v2662_v51 = vmax.f32 %v2643_v45, 0.0 }
 0xf0a   : > { %v2663_v50 = vmax.f32 %v2592_v47, 0.0  ;;  %v2665_v12 = vmax.f32 %v2645_v49, 0.0 }
 0xf0b   : > { %v2664_v53 = vmax.f32 %v2594_v61, 0.0  ;;  %v2666_v54 = vmax.f32 %v2647_v41, 0.0 }
 0xf0c   : > { %v2675_v60 = vpack.c.bf16 %v2663_v50, %v2659_v43  ;;  %v2677_v62 = vpack.c.bf16 %v2665_v12, %v2661_v48 }
 0xf0d   : > { %v2676_v0 = vpack.c.bf16 %v2664_v53, %v2660_v15  ;;  %v2678_v8 = vpack.c.bf16 %v2666_v54, %v2662_v51  ;;  %v2597_v57 = vpop.f32.mrb[48].mxu0  ;;  %v2650_v1 = vpop.f32.mrb[40].mxu1 }
 0xf0e   : > { %v2598_v55 = vadd.f32 %v2597_v57, %v2376_v31  ;;  %v2651_v2 = vadd.f32 %v2650_v1, %v2384_v32  ;;  %v2599_v3 = vpop.f32.mrb[49].mxu0  ;;  %v2652_v4 = vpop.f32.mrb[41].mxu1 }
 0xf0f   : > { %v2600_v5 = vadd.f32 %v2599_v3, %v2380_v33  ;;  %v2653_v6 = vadd.f32 %v2652_v4, %v2388_v34  ;;  %v2601_v7 = vpop.f32.mrb[50].mxu0  ;;  %v2654_v9 = vpop.f32.mrb[42].mxu1  ;;  %2978 = vmatprep.mubr.bf16.mxu0 %v2676_v0  ;;  %3027 = vmatprep.mubr.bf16.mxu1 %v2678_v8 }
 0xf10   : > { %v2602_v10 = vadd.f32 %v2601_v7, %v2376_v31  ;;  %v2655_v11 = vadd.f32 %v2654_v9, %v2384_v32  ;;  %v2603_v13 = vpop.f32.mrb[51].mxu0  ;;  %v2656_v16 = vpop.f32.mrb[43].mxu1  ;;  %2979 = vmatmul.mubr.bf16.vlgmr.msra.gmra.mrb[52].mxu0 %v2675_v60  ;;  %3028 = vmatmul.mubr.bf16.vlgmr.msra.gmra.mrb[44].mxu1 %v2677_v62  ;;  %v2667_v19 = vmax.f32 %v2598_v55, 0.0  ;;  %v2669_v20 = vmax.f32 %v2651_v2, 0.0 }
 0xf11   : > { %v2604_v17 = vadd.f32 %v2603_v13, %v2380_v33  ;;  %v2657_v18 = vadd.f32 %v2656_v16, %v2388_v34  ;;  %v2668_v23 = vmax.f32 %v2600_v5, 0.0  ;;  %v2670_v24 = vmax.f32 %v2653_v6, 0.0  ;;  %v3510_v33 = vld [vmem:[%s694_s25] ss:$0 sm:$0xff] }
 0xf12   : > { %v2671_v21 = vmax.f32 %v2602_v10, 0.0  ;;  %v2673_v22 = vmax.f32 %v2655_v11, 0.0 }
 0xf13   : > { %v2672_v25 = vmax.f32 %v2604_v17, 0.0  ;;  %v2674_v26 = vmax.f32 %v2657_v18, 0.0 }
 0xf14   : > { %v2679_v27 = vpack.c.bf16 %v2671_v21, %v2667_v19  ;;  %v2681_v28 = vpack.c.bf16 %v2673_v22, %v2669_v20 }
 0xf15   : > { %v2680_v29 = vpack.c.bf16 %v2672_v25, %v2668_v23  ;;  %v2682_v30 = vpack.c.bf16 %v2674_v26, %v2670_v24 }
 0xf17   : > { %2986 = vmatprep.mubr.bf16.mxu0 %v2680_v29  ;;  %3035 = vmatprep.mubr.bf16.mxu1 %v2682_v30 }
 0xf18   : > { %2987 = vmatmul.mubr.bf16.gmra.mrb[56].mxu0 %v2679_v27  ;;  %3036 = vmatmul.mubr.bf16.gmra.mrb[48].mxu1 %v2681_v28 }
 0xfe3   : > { %v3661_v31 = vpop.f32.mrb[52].mxu0  ;;  %v3689_v32 = vpop.f32.mrb[44].mxu1 }
 0xfe4   : > { %v3662_v34 = vpop.f32.mrb[53].mxu0  ;;  %v3690_v35 = vpop.f32.mrb[45].mxu1 }
 0xfe5   : > { %v3663_v36 = vadd.f32 %v3662_v34, %v3661_v31  ;;  %v3691_v38 = vadd.f32 %v3690_v35, %v3689_v32  ;;  %v3664_v39 = vpop.f32.mrb[54].mxu0  ;;  %v3692_v40 = vpop.f32.mrb[46].mxu1 }
 0xfe6   : > { %v3665_v42 = vpop.f32.mrb[55].mxu0  ;;  %v3693_v44 = vpop.f32.mrb[47].mxu1 }
 0xfe7   : > { %v2981_v45 = vadd.f32 %v3663_v36, %v3510_v33  ;;  %v3666_v46 = vadd.f32 %v3665_v42, %v3664_v39  ;;  %v3694_v37 = vadd.f32 %v3693_v44, %v3692_v40  ;;  %v3544_v36 = vld [vmem:[%s700_s16] ss:$0 sm:$0xff] }
 0xfe9   : > { %v3030_v47 = vadd.f32 %v3691_v38, %v2981_v45  ;;  %v2984_v49 = vadd.f32 %v3666_v46, %v3510_v33 }
 0xfeb   : > { %v3033_v52 = vadd.f32 %v3694_v37, %v2984_v49  ;;  %v3667_v59 = vpop.f32.mrb[56].mxu0  ;;  %v3695_v61 = vpop.f32.mrb[48].mxu1  ;;  %v3044_v41 = vadd.f32 %v3030_v47, %v5286_v56 }
 0xfec   : > { %v3668_v43 = vpop.f32.mrb[57].mxu0  ;;  %v3696_v48 = vpop.f32.mrb[49].mxu1 }
 0xfed   : > { %v3669_v50 = vadd.f32 %v3668_v43, %v3667_v59  ;;  %v3697_v12 = vadd.f32 %v3696_v48, %v3695_v61  ;;  %v3670_v15 = vpop.f32.mrb[58].mxu0  ;;  %v3698_v51 = vpop.f32.mrb[50].mxu1  ;;  %3050 = vadd.xlane.f32.xlu1 %v3044_v41  ;;  %v3045_v53 = vadd.f32 %v3033_v52, %v5288_v58 }
 0xfee   : > { %v3671_v54 = vpop.f32.mrb[59].mxu0  ;;  %v3699_v60 = vpop.f32.mrb[51].mxu1 }
 0xfef   : > { %v2989_v62 = vadd.f32 %v3669_v50, %v3510_v33  ;;  %v3672_v0 = vadd.f32 %v3671_v54, %v3670_v15  ;;  %v3700_v8 = vadd.f32 %v3699_v60, %v3698_v51  ;;  %3052 = vadd.xlane.f32.xlu0 %v3045_v53 }
 0xff1   : > { %v3038_v57 = vadd.f32 %v3697_v12, %v2989_v62  ;;  %v2992_v1 = vadd.f32 %v3672_v0, %v3510_v33  ;;  %v3543_v33 = vld [vmem:[%s697_s24] ss:$0 sm:$0xff]  ;;  %s5540_s24 = sld [smem:[#allocation22_spill]] }
 0xff3   : > { %v3041_v55 = vadd.f32 %v3700_v8, %v2992_v1  ;;  %v3046_v56 = vadd.f32 %v3038_v57, %v5306_v63 }
 0xff5   : > { %3054 = vadd.xlane.f32.xlu1 %v3046_v56  ;;  %v3047_v2 = vadd.f32 %v3041_v55, %v5300_v14 }
 0xff7   : > { %3056 = vadd.xlane.f32.xlu0 %v3047_v2  ;;  %p3545_p10 = scmp.ne.s32.totalorder %s5540_s24, 1 }
0x107a   : > { %v3051_v3 = vpop.xlane.xlu1 %3050 }
0x107b   : > { %v3058_v4 = vmul.f32 0.0078125, %v3051_v3 }
0x107c   : > { %v3053_v5 = vpop.xlane.xlu0 %3052 }
0x107d   : > { %v3062_v6 = vsub.f32 %v3044_v41, %v3058_v4  ;;  %v3059_v58 = vmul.f32 0.0078125, %v3053_v5 }
0x107f   : > { %v3063_v7 = vsub.f32 %v3045_v53, %v3059_v58  ;;  %v3066_v9 = vmul.f32 %v3062_v6, %v3062_v6 }
0x1081   : > { %3070 = vadd.xlane.f32.xlu1 %v3066_v9  ;;  %v3067_v10 = vmul.f32 %v3063_v7, %v3063_v7 }
0x1082   : > { %v3055_v11 = vpop.xlane.xlu1 %3054 }
0x1083   : > { %v3060_v13 = vmul.f32 0.0078125, %v3055_v11  ;;  %3072 = vadd.xlane.f32.xlu0 %v3067_v10 }
0x1084   : > { %v3057_v16 = vpop.xlane.xlu0 %3056 }
0x1085   : > { %v3064_v17 = vsub.f32 %v3046_v56, %v3060_v13  ;;  %v3061_v18 = vmul.f32 0.0078125, %v3057_v16 }
0x1087   : > { %v3065_v63 = vsub.f32 %v3047_v2, %v3061_v18  ;;  %v3068_v19 = vmul.f32 %v3064_v17, %v3064_v17 }
0x1089   : > { %3074 = vadd.xlane.f32.xlu1 %v3068_v19  ;;  %v3069_v14 = vmul.f32 %v3065_v63, %v3065_v63 }
0x108b   : > { %3076 = vadd.xlane.f32.xlu0 %v3069_v14 }
0x110e   : > { %v3071_v20 = vpop.xlane.xlu1 %3070 }
0x110f   : > { %v3078_v21 = vmul.f32 0.0078125, %v3071_v20 }
0x1110   : > { %v3073_v22 = vpop.xlane.xlu0 %3072 }
0x1111   : > { %v3082_v23 = vadd.f32 1e-05, %v3078_v21  ;;  %v3079_v24 = vmul.f32 0.0078125, %v3073_v22 }
0x1113   : > { %4191 = vrsqrt.f32 %v3082_v23  ;;  %v3083_v25 = vadd.f32 1e-05, %v3079_v24 }
0x1115   : > { %4193 = vrsqrt.f32 %v3083_v25 }
0x1116   : > { %v3075_v26 = vpop.xlane.xlu1 %3074 }
0x1117   : > { %v3080_v27 = vmul.f32 0.0078125, %v3075_v26 }
0x1118   : > { %v3077_v28 = vpop.xlane.xlu0 %3076 }
0x1119   : > { %v3084_v29 = vadd.f32 1e-05, %v3080_v27  ;;  %v3081_v30 = vmul.f32 0.0078125, %v3077_v28 }
0x111b   : > { %4195 = vrsqrt.f32 %v3084_v29  ;;  %v3085_v31 = vadd.f32 1e-05, %v3081_v30 }
0x111d   : > { %v4192_v32 = vpop.eup %4191  ;;  %4197 = vrsqrt.f32 %v3085_v31 }
0x111e   : > { %v3090_v34 = vmul.f32 %v4192_v32, %v3062_v6 }
0x111f   : > { %v4194_v35 = vpop.eup %4193 }
0x1120   : > { %v3100_v38 = vmul.f32 %v3543_v33, %v3090_v34  ;;  %v3091_v39 = vmul.f32 %v4194_v35, %v3063_v7 }
0x1122   : > { %v3110_v40 = vadd.f32 %v3544_v36, %v3100_v38  ;;  %v3101_v42 = vmul.f32 %v3543_v33, %v3091_v39 }
0x1124   : > { %3114 = vst [vmem:[#allocation2] sm:$0xff] %v3110_v40  ;;  %v3111_v44 = vadd.f32 %v3544_v36, %v3101_v42 }
0x1125   : > { %v4196_v45 = vpop.eup %4195 }
0x1126   : > { %3115 = vst [vmem:[#allocation2 + $0x8] sm:$0xff] %v3111_v44  ;;  %v3092_v46 = vmul.f32 %v4196_v45, %v3064_v17  ;;  %v3578_v41 = vpack.c.bf16 (!%p3545_p10), %v3111_v44, %v3110_v40 }
0x1127   : > { %v4198_v37 = vpop.eup %4197 }
0x1128   : > { %v3102_v47 = vmul.f32 %v3543_v33, %v3092_v46  ;;  %v3093_v49 = vmul.f32 %v4198_v37, %v3065_v63  ;;  %3121 = sbr.rel (%p3545_p10) target bundleno = 4401 (0x1131), region = 96  ;;  %3579 = vst [vmem:[%s4985_s15] sm:$0xff] (!%p3545_p10), %v3578_v41  }
0x112a   : > { %v3112_v52 = vadd.f32 %v3544_v36, %v3102_v47  ;;  %v3103_v59 = vmul.f32 %v3543_v33, %v3093_v49 }
0x112c   : > { %3116 = vst [vmem:[#allocation2 + $0x10] sm:$0xff] %v3112_v52  ;;  %v3113_v61 = vadd.f32 %v3544_v36, %v3103_v59 }
0x112e   : > { %3117 = vst [vmem:[#allocation2 + $0x18] sm:$0xff] %v3113_v61  ;;  %v3583_v43 = vpack.c.bf16 (!%p3545_p10), %v3113_v61, %v3112_v52 }
0x1130   : > { %3586 = vst [vmem:[%s4985_s15 + $0x8] sm:$0xff] %v3583_v43  }
0x1131 PF: > { %s5541_s23 = sld [smem:[#allocation23_spill]]  ;;  %s5542_s3 = sld [smem:[#allocation45_spill]] }
0x1132   : > { %s3157_s29 = sshll.u32 %s4985_s15, 4  ;;  %s3143_s10 = scalar_lea.sflag [#allocation5], %s4919_s19  ;;  %s5362_s29 = int_to_ptr.vmem [resolvable:$true] %s3157_s29 }
0x1133   : > { %s4353_s28 = scalar_lea.vmem %s5362_s29, 256  ;;  %p5543_p7 = scmp.ne.s32.totalorder %s5508_s14, 0 }
0x1134   : > { %p4354_p13 = scmp.ne.s32.totalorder %s5362_s29, %s4353_s28  ;;  %s4502_s4 = smov [#allocation12]  }
0x1135   : > { %s4357_s5 = sshll.u32 %s4502_s4, 4  ;;  %s4358_s5 = int_to_ptr.vmem [resolvable:$false] %s4357_s5 }
0x1136   : > { %p4355_p3 = pnand %p4354_p13, %p5543_p7  ;;  %s4359_s22 = scalar_lea.vmem %s4358_s5, 512 }
0x1137   : > { %s3566_s16 = sshll.u32 %s5541_s23, 8  ;;  %p4360_p12 = scmp.lt.s32.totalorder %s5362_s29, %s4358_s5 }
0x1138   : > { %s5359_s8 = scalar_lea.hbm %s5542_s3, %s3566_s16  ;;  %p4356_p6 = pneg %p4355_p3 }
0x1139   : > { %p4361_p0 = scmp.lt.s32.totalorder %s4359_s22, %s4353_s28 }
0x113b   : > { %p4362_p2 = por %p4361_p0, %p4360_p12 }
0x113d   : > { %p4363_p8 = pnand %p4362_p2, %p4356_p6 }
0x113f   : > { %4366 = shalt.err (!%p4363_p8)
}
0x1140   : > { %s4367_s15 = scalar_lea.hbm %s5359_s8, 256  ;;  %s4371_s9 = scalar_lea.hbm %s5542_s3, 512 }
0x1141   : > { %p4368_p9 = scmp.ne.s32.totalorder %s5359_s8, %s4367_s15  ;;  %p4372_p11 = scmp.lt.u32.totalorder %s5359_s8, %s5542_s3 }
0x1142   : > { %p4373_p1 = scmp.lt.u32.totalorder %s4371_s9, %s4367_s15  ;;  %p4375_p13 = scmp.lt.u32.totalorder %s4367_s15, %s5359_s8 }
0x1143   : > { %p4369_p5 = pnand %p4368_p9, %p5543_p7 }
0x1144   : > { %p4374_p10 = por %p4373_p1, %p4372_p11 }
0x1145   : > { %p4370_p4 = pneg %p4369_p5 }
0x1146   : > { %p4376_p3 = por %p4375_p13, %p4374_p10 }
0x1148   : > { %p4377_p6 = pnand %p4376_p3, %p4370_p4 }
0x114a   : > { %4380 = shalt.err (!%p4377_p6)
}
0x114b   : > { %s4503_s26 = smov 4  }
0x114c   : > { %3874 = dma.vmem_to_hbm [thread:$0]  (%p5543_p7), %s5362_s29, 256, %s5359_s8, %s3143_s10, %s4500_s2, %s4500_s2, %s4503_s26  }
0x114d PF: > { %s5544_s30 = sld [smem:[#allocation19_spill]]  ;;  %s5545_s25 = sld [smem:[#allocation32_spill]] }
0x114e   : > { %p3897_p12 = scmp.ge.s32.totalorder %s4483_s13, 2 }
0x1153   : > { %s3172_s7 = sand.u32 1, %s5544_s30   ;;  %p5546_p0 = scmp.ne.s32.totalorder %s5545_s25, 0 }
0x1154   : > { %s3173_s6 = scalar_lea.sflag [#allocation5], %s3172_s7 }
0x1155   : > { %p3893_p2 = pnand %p3897_p12, %p5546_p0 }
0x1157   : > { %4438 = dma.done.wait (!%p3893_p2), %s3173_s6, 256  }
0x1158   : > { %4440 = vsyncadd (!%p3893_p2), %s3173_s6, 4294967040  ;;  %s34_s13 = sadd.s32 1, %s4483_s13   ;;  %s5547_s21 = sld [smem:[#allocation17_spill]] }
0x1159   : > { %p31_p8 = scmp.ge.s32.totalorder %s34_s13, 6   ;;  %s5548_s22 = sld [smem:[#allocation18_spill]] }
0x115a   : > { %s5549_s23 = sld [smem:[#allocation27_spill]]  ;;  %s5550_s24 = sld [smem:[#allocation20_spill]] }
0x115b   : > { %s5551_s25 = sld [smem:[#allocation21_spill]]  ;;  %s5552_s26 = sld [smem:[#allocation31_spill]] }
0x115c   : > { %s5553_s27 = sld [smem:[#allocation24_spill]]  ;;  %s5554_s28 = sld [smem:[#allocation25_spill]] }
0x115d   : > { %s5555_s29 = sld [smem:[#allocation26_spill]]  ;;  %s5556_s30 = sld [smem:[#allocation29_spill]] }
0x115e   :  { %33 = sbr.rel (!%p31_p8) target bundleno = 27 (0x1b), region = 190 }
0x1165   :  { %3178 = vsyncpa [#allocation4], 1 }
0x1166   :  { %3180 = vsyncpa [#allocation4 + $0x1], 1 }
0x1167   :  { %3181 = vsyncpa [#allocation7], 1 }
0x1168   :  { %3183 = vsyncpa [#allocation7 + $0x1], 1 }
0x1169   :  { %3184 = vsyncpa [#allocation10], 1 }
0x116a   :  { %3186 = vsyncpa [#allocation10 + $0x1], 1 }
0x116b   :  { %3187 = vsyncpa [#allocation5], 1 }
0x116c   :  { %3189 = vsyncpa [#allocation5 + $0x1], 1 }

</bundles_post_ra>
